<compile_context>
chip_gen: v5e
topology: v5e:2x2
jax: 0.10.0
libtpu: 0.0.40
codegen_flags: <defaults>
</compile_context>

<pallas_src>
import functools

import jax
import jax.numpy as jnp
import numpy as np
from jax.experimental import pallas as pl
from jax.experimental.pallas import tpu as pltpu


# ----------------------------------------------------------------------------
# Pallas kernel: whole (tiny) problem in one shot, lane-dense [N*H, W*C].
# ----------------------------------------------------------------------------
def _rpblock_kernel(x_ref, w1_ref, b1_ref, w2_ref, b2_ref, o_ref, *, H, W, C):
    NH, WC = x_ref.shape                                  # N*H, W*C
    x = x_ref[...].astype(jnp.float32)                    # bf16 -> f32 (lossless)

    # Edge masks for the 3x3 taps (per-image row index and per-pixel lane idx).
    row = jax.lax.broadcasted_iota(jnp.int32, (NH, WC), 0) % H
    lane = jax.lax.broadcasted_iota(jnp.int32, (NH, WC), 1)
    zero = jnp.zeros_like(x)

    # 9 shifted taps via XLU rolls + VPU masks; no relayout copies of x.
    taps = []
    for ky in range(3):
        dy = ky - 1
        if dy == 0:
            xv = x
        else:
            xv = pltpu.roll(x, shift=(-dy) % NH, axis=0)  # row y+dy
            ok = (row != H - 1) if dy == 1 else (row != 0)
            xv = jnp.where(ok, xv, zero)                  # zero-pad + stop
        for kx in range(3):                               # batch-boundary leak
            dx = kx - 1
            if dx == 0:
                t = xv
            else:
                t = pltpu.roll(xv, shift=(-dx * C) % WC, axis=1)   # col x+dx
                ok = (lane < (W - 1) * C) if dx == 1 else (lane >= C)
                t = jnp.where(ok, t, zero)
            taps.append(t)

    # Lane-axis im2col: each tap is a full 128-lane chunk -> no relayout.
    patches = jnp.concatenate(taps, axis=1).astype(jnp.bfloat16)   # [NH, 9*W*C]

    # Stage 1: branch0 (1x1, centre tap) + branch1 (3x3) in one MXU matmul
    # against a per-pixel block-diagonal weight; f32 accumulation.
    y = jnp.dot(patches, w1_ref[...], preferred_element_type=jnp.float32)
    y = jnp.maximum(y + b1_ref[...], 0.0)                          # [NH, W*Ccat]

    # Stage 2: fuse 1x1 conv over the (virtual) concat + ReLU + residual.
    z = jnp.dot(y.astype(jnp.bfloat16), w2_ref[...],
                preferred_element_type=jnp.float32)
    z = jnp.maximum(z + b2_ref[...], 0.0) + x                      # residual
    # NOTE: residual uses the bf16-rounded x (input is bf16 by design).

    o_ref[...] = z.astype(o_ref.dtype)                             # bf16 store


# ----------------------------------------------------------------------------
# Wrapper
# ----------------------------------------------------------------------------
def rpblock_pallas(x_nhwc, w1, b1, w2, b2):
    N, H, W, C = x_nhwc.shape
    NH, WC = N * H, W * C
    WCcat = w1.shape[1]                                   # W * Ccat

    x2 = x_nhwc.reshape(NH, WC).astype(jnp.bfloat16)      # lane-dense slab

    kernel = functools.partial(_rpblock_kernel, H=H, W=W, C=C)

    out = pl.pallas_call(
        kernel,
        out_shape=jax.ShapeDtypeStruct((NH, WC), jnp.bfloat16),
        grid=(1,),                                        # batch folded into M
        in_specs=[
            pl.BlockSpec((NH, WC), lambda i: (0, 0)),
            pl.BlockSpec((9 * WC, WCcat), lambda i: (0, 0)),
            pl.BlockSpec((1, WCcat), lambda i: (0, 0)),
            pl.BlockSpec((WCcat, WC), lambda i: (0, 0)),
            pl.BlockSpec((1, WC), lambda i: (0, 0)),
        ],
        out_specs=pl.BlockSpec((NH, WC), lambda i: (0, 0)),
        compiler_params=pltpu.CompilerParams(
            dimension_semantics=("arbitrary",)),
    )(x2, w1, b1, w2, b2)

    return out.reshape(N, H, W, C)


# ----------------------------------------------------------------------------
# Parameter construction (deterministic) + BN folding (eval-mode BN)
# ----------------------------------------------------------------------------
def fold_bn(w, b, gamma, beta, mean, var, eps=1e-5):
    """Fold inference-mode BN into a conv.  w: [..., Cin, Cout], b: [Cout]."""
    scale = gamma / jnp.sqrt(var + eps)
    return w * scale, (b - mean) * scale + beta


def make_params(key, C):
    C1 = int(C * 0.8)
    ks = jax.random.split(key, 16)

    def bn_params(k, ch):
        k1, k2, k3, k4 = jax.random.split(k, 4)
        gamma = 1.0 + 0.1 * jax.random.normal(k1, (ch,), jnp.float32)
        beta = 0.1 * jax.random.normal(k2, (ch,), jnp.float32)
        mean = 0.1 * jax.random.normal(k3, (ch,), jnp.float32)
        var = 1.0 + 0.1 * jnp.abs(jax.random.normal(k4, (ch,), jnp.float32))
        return gamma, beta, mean, var

    p = {}
    # branch 0: 1x1 conv C -> C               weight layout [Cin, Cout]
    p["w0"] = 0.1 * jax.random.normal(ks[0], (C, C), jnp.float32)
    p["b0"] = 0.1 * jax.random.normal(ks[1], (C,), jnp.float32)
    p["bn0"] = bn_params(ks[2], C)
    # branch 1: 3x3 conv C -> C1              weight layout [kh, kw, Cin, Cout]
    p["w1"] = 0.1 * jax.random.normal(ks[3], (3, 3, C, C1), jnp.float32)
    p["b1"] = 0.1 * jax.random.normal(ks[4], (C1,), jnp.float32)
    p["bn1"] = bn_params(ks[5], C1)
    # fuse: 1x1 conv (C + C1) -> C
    p["wf"] = 0.1 * jax.random.normal(ks[6], (C + C1, C), jnp.float32)
    p["bf"] = 0.1 * jax.random.normal(ks[7], (C,), jnp.float32)
    p["bnf"] = bn_params(ks[8], C)
    return p


def folded_params(p, C, W):
    """Fold BN, pad C1 to a multiple of 8, fuse branch0 into the centre tap,
    and expand everything into per-pixel block-diagonal lane-dense weights."""
    C1 = p["w1"].shape[-1]
    C1p = ((C1 + 7) // 8) * 8
    Ccat = C + C1p

    fw0, fb0 = fold_bn(p["w0"], p["b0"], *p["bn0"])          # [C,C], [C]
    fw1, fb1 = fold_bn(p["w1"], p["b1"], *p["bn1"])          # [3,3,C,C1], [C1]
    fwf, fbf = fold_bn(p["wf"], p["bf"], *p["bnf"])          # [C+C1,C], [C]

    eye_w = jnp.eye(W, dtype=jnp.float32)

    # Stage-1: per-tap per-pixel blocks [C, Ccat], block-diag over W pixels.
    blocks = []
    for ky in range(3):
        for kx in range(3):
            blk = jnp.zeros((C, Ccat), jnp.float32)
            if ky == 1 and kx == 1:
                blk = blk.at[:, :C].set(fw0)                 # branch0 1x1
            blk = blk.at[:, C:C + C1].set(fw1[ky, kx])       # branch1 3x3 tap
            blocks.append(jnp.kron(eye_w, blk))              # [W*C, W*Ccat]
    w1_full = jnp.concatenate(blocks, axis=0)                # [9*W*C, W*Ccat]

    b1_pix = jnp.zeros((Ccat,), jnp.float32)
    b1_pix = b1_pix.at[:C].set(fb0).at[C:C + C1].set(fb1)    # padded chans -> 0
    b1_full = jnp.tile(b1_pix, (W,)).reshape(1, W * Ccat)

    # Stage-2: per-pixel fuse weight [Ccat, C] (zero rows for padded chans).
    wf_pix = jnp.zeros((Ccat, C), jnp.float32)
    wf_pix = wf_pix.at[:C].set(fwf[:C]).at[C:C + C1].set(fwf[C:])
    w2_full = jnp.kron(eye_w, wf_pix)                        # [W*Ccat, W*C]
    b2_full = jnp.tile(fbf, (W,)).reshape(1, W * C)

    return (w1_full.astype(jnp.bfloat16), b1_full,
            w2_full.astype(jnp.bfloat16), b2_full)


# ----------------------------------------------------------------------------
# Pure-JAX reference (independent path: lax.conv, un-folded BN, full f32)
# ----------------------------------------------------------------------------
def reference_forward(x_nhwc, p, eps=1e-5):
    dn = ("NHWC", "HWIO", "NHWC")

    def bn(y, params):
        gamma, beta, mean, var = params
        return (y - mean) / jnp.sqrt(var + eps) * gamma + beta

    y0 = jax.lax.conv_general_dilated(x_nhwc, p["w0"][None, None], (1, 1),
                                      "VALID", dimension_numbers=dn) + p["b0"]
    y0 = jax.nn.relu(bn(y0, p["bn0"]))
    y1 = jax.lax.conv_general_dilated(x_nhwc, p["w1"], (1, 1),
                                      "SAME", dimension_numbers=dn) + p["b1"]
    y1 = jax.nn.relu(bn(y1, p["bn1"]))
    cat = jnp.concatenate([y0, y1], axis=-1)
    z = jax.lax.conv_general_dilated(cat, p["wf"][None, None], (1, 1),
                                     "VALID", dimension_numbers=dn) + p["bf"]
    z = jax.nn.relu(bn(z, p["bnf"]))
    return z + x_nhwc


# ----------------------------------------------------------------------------
if __name__ == "__main__":
    key = jax.random.PRNGKey(0)
    kx, kp = jax.random.split(key)

    N, C, H, W = 2, 8, 16, 16                      # PyTorch-style NCHW shape
    x_nchw = jax.random.normal(kx, (N, C, H, W), jnp.float32)
    x_nhwc = jnp.transpose(x_nchw, (0, 2, 3, 1))   # kernel layout (W*C = 128)

    params = make_params(kp, C)
    w1, b1, w2, b2 = folded_params(params, C, W)

    out_nhwc = rpblock_pallas(x_nhwc, w1, b1, w2, b2)
    out_nhwc = jax.block_until_ready(out_nhwc)

    ref_nhwc = reference_forward(x_nhwc, params)
    # bf16 activations/weights/output in the kernel vs. full-f32 reference.
    np.testing.assert_allclose(np.asarray(out_nhwc).astype(np.float32),
                               np.asarray(ref_nhwc), rtol=3e-2, atol=1e-1)

    print("KERNEL_OK")
</pallas_src>

<mosaic_0001>
module attributes {stable_mosaic.version = 11 : i64} {
  func.func @_rpblock_kernel(%arg0: i32, %arg1: memref<32x128xbf16, #tpu.memory_space<vmem>>, %arg2: memref<1152x256xbf16, #tpu.memory_space<vmem>>, %arg3: memref<1x256xf32, #tpu.memory_space<vmem>>, %arg4: memref<256x128xbf16, #tpu.memory_space<vmem>>, %arg5: memref<1x128xf32, #tpu.memory_space<vmem>>, %arg6: memref<32x128xbf16, #tpu.memory_space<vmem>>) attributes {dimension_semantics = [#tpu.dimension_semantics<arbitrary>], iteration_bounds = array<i64: 1>, scalar_prefetch = 0 : i64, scratch_operands = 0 : i64, tpu.core_type = #tpu.core_type<tc>, window_params = [{pipeline_mode = #tpu.pipeline_mode<synchronous>, transform_indices = @transform_0, window_bounds = array<i64: 32, 128>}, {pipeline_mode = #tpu.pipeline_mode<synchronous>, transform_indices = @transform_1, window_bounds = array<i64: 1152, 256>}, {pipeline_mode = #tpu.pipeline_mode<synchronous>, transform_indices = @transform_2, window_bounds = array<i64: 1, 256>}, {pipeline_mode = #tpu.pipeline_mode<synchronous>, transform_indices = @transform_3, window_bounds = array<i64: 256, 128>}, {pipeline_mode = #tpu.pipeline_mode<synchronous>, transform_indices = @transform_4, window_bounds = array<i64: 1, 128>}, {pipeline_mode = #tpu.pipeline_mode<synchronous>, transform_indices = @transform_5, window_bounds = array<i64: 32, 128>}]} {
    %c0 = arith.constant 0 : index
    %c0_0 = arith.constant 0 : index
    %0 = vector.load %arg1[%c0, %c0_0] : memref<32x128xbf16, #tpu.memory_space<vmem>>, vector<32x128xbf16>
    %1 = arith.extf %0 : vector<32x128xbf16> to vector<32x128xf32>
    %2 = tpu.iota {dimensions = array<i32: 0>} : vector<32x128xi32>
    %c16_i32 = arith.constant 16 : i32
    %c0_i32 = arith.constant 0 : i32
    %3 = arith.cmpi eq, %c16_i32, %c0_i32 : i32
    %c1_i32 = arith.constant 1 : i32
    %4 = arith.select %3, %c1_i32, %c16_i32 : i32
    %5 = vector.broadcast %4 : i32 to vector<32x128xi32>
    %6 = arith.remsi %2, %5 : vector<32x128xi32>
    %c0_i32_1 = arith.constant 0 : i32
    %7 = vector.broadcast %c0_i32_1 : i32 to vector<32x128xi32>
    %8 = arith.cmpi ne, %6, %7 : vector<32x128xi32>
    %c0_i32_2 = arith.constant 0 : i32
    %9 = vector.broadcast %c0_i32_2 : i32 to vector<32x128xi32>
    %10 = arith.cmpi slt, %6, %9 : vector<32x128xi32>
    %c0_i32_3 = arith.constant 0 : i32
    %11 = arith.cmpi slt, %4, %c0_i32_3 : i32
    %12 = vector.broadcast %11 : i1 to vector<32x128xi1>
    %13 = vector.broadcast %12 : vector<32x128xi1> to vector<32x128xi1>
    %14 = arith.xori %10, %13 : vector<32x128xi1>
    %15 = arith.andi %14, %8 : vector<32x128xi1>
    %16 = vector.broadcast %4 : i32 to vector<32x128xi32>
    %17 = arith.addi %6, %16 : vector<32x128xi32>
    %18 = arith.select %15, %17, %6 : vector<32x128xi1>, vector<32x128xi32>
    %19 = tpu.iota {dimensions = array<i32: 1>} : vector<32x128xi32>
    %cst = arith.constant 0.000000e+00 : f32
    %20 = vector.broadcast %cst : f32 to vector<32x128xf32>
    %c1_i32_4 = arith.constant 1 : i32
    %21 = tpu.dynamic_rotate %1 by %c1_i32_4 dim 0 : vector<32x128xf32>, i32 -> vector<32x128xf32>
    %c0_i32_5 = arith.constant 0 : i32
    %22 = vector.broadcast %c0_i32_5 : i32 to vector<32x128xi32>
    %23 = arith.cmpi ne, %18, %22 : vector<32x128xi32>
    %24 = arith.select %23, %21, %20 : vector<32x128xi1>, vector<32x128xf32>
    %c8_i32 = arith.constant 8 : i32
    %25 = tpu.dynamic_rotate %24 by %c8_i32 dim 1 : vector<32x128xf32>, i32 -> vector<32x128xf32>
    %c8_i32_6 = arith.constant 8 : i32
    %26 = vector.broadcast %c8_i32_6 : i32 to vector<32x128xi32>
    %27 = arith.cmpi sge, %19, %26 : vector<32x128xi32>
    %28 = arith.select %27, %25, %20 : vector<32x128xi1>, vector<32x128xf32>
    %c120_i32 = arith.constant 120 : i32
    %29 = tpu.dynamic_rotate %24 by %c120_i32 dim 1 : vector<32x128xf32>, i32 -> vector<32x128xf32>
    %c120_i32_7 = arith.constant 120 : i32
    %30 = vector.broadcast %c120_i32_7 : i32 to vector<32x128xi32>
    %31 = arith.cmpi slt, %19, %30 : vector<32x128xi32>
    %32 = arith.select %31, %29, %20 : vector<32x128xi1>, vector<32x128xf32>
    %c8_i32_8 = arith.constant 8 : i32
    %33 = tpu.dynamic_rotate %1 by %c8_i32_8 dim 1 : vector<32x128xf32>, i32 -> vector<32x128xf32>
    %c8_i32_9 = arith.constant 8 : i32
    %34 = vector.broadcast %c8_i32_9 : i32 to vector<32x128xi32>
    %35 = arith.cmpi sge, %19, %34 : vector<32x128xi32>
    %36 = arith.select %35, %33, %20 : vector<32x128xi1>, vector<32x128xf32>
    %c120_i32_10 = arith.constant 120 : i32
    %37 = tpu.dynamic_rotate %1 by %c120_i32_10 dim 1 : vector<32x128xf32>, i32 -> vector<32x128xf32>
    %c120_i32_11 = arith.constant 120 : i32
    %38 = vector.broadcast %c120_i32_11 : i32 to vector<32x128xi32>
    %39 = arith.cmpi slt, %19, %38 : vector<32x128xi32>
    %40 = arith.select %39, %37, %20 : vector<32x128xi1>, vector<32x128xf32>
    %c31_i32 = arith.constant 31 : i32
    %41 = tpu.dynamic_rotate %1 by %c31_i32 dim 0 : vector<32x128xf32>, i32 -> vector<32x128xf32>
    %c15_i32 = arith.constant 15 : i32
    %42 = vector.broadcast %c15_i32 : i32 to vector<32x128xi32>
    %43 = arith.cmpi ne, %18, %42 : vector<32x128xi32>
    %44 = arith.select %43, %41, %20 : vector<32x128xi1>, vector<32x128xf32>
    %c8_i32_12 = arith.constant 8 : i32
    %45 = tpu.dynamic_rotate %44 by %c8_i32_12 dim 1 : vector<32x128xf32>, i32 -> vector<32x128xf32>
    %c8_i32_13 = arith.constant 8 : i32
    %46 = vector.broadcast %c8_i32_13 : i32 to vector<32x128xi32>
    %47 = arith.cmpi sge, %19, %46 : vector<32x128xi32>
    %48 = arith.select %47, %45, %20 : vector<32x128xi1>, vector<32x128xf32>
    %c120_i32_14 = arith.constant 120 : i32
    %49 = tpu.dynamic_rotate %44 by %c120_i32_14 dim 1 : vector<32x128xf32>, i32 -> vector<32x128xf32>
    %c120_i32_15 = arith.constant 120 : i32
    %50 = vector.broadcast %c120_i32_15 : i32 to vector<32x128xi32>
    %51 = arith.cmpi slt, %19, %50 : vector<32x128xi32>
    %52 = arith.select %51, %49, %20 : vector<32x128xi1>, vector<32x128xf32>
    %53 = tpu.concatenate %28, %24, %32, %36, %1, %40, %48, %44, %52 in 1 : vector<32x128xf32>, vector<32x128xf32>, vector<32x128xf32>, vector<32x128xf32>, vector<32x128xf32>, vector<32x128xf32>, vector<32x128xf32>, vector<32x128xf32>, vector<32x128xf32> -> vector<32x1152xf32>
    %54 = arith.truncf %53 : vector<32x1152xf32> to vector<32x1152xbf16>
    %c0_16 = arith.constant 0 : index
    %c0_17 = arith.constant 0 : index
    %55 = vector.load %arg2[%c0_16, %c0_17] : memref<1152x256xbf16, #tpu.memory_space<vmem>>, vector<1152x256xbf16>
    %cst_18 = arith.constant dense<0.000000e+00> : vector<32x256xf32>
    %56 = tpu.matmul %54, %55, %cst_18 {dimension_numbers = #tpu.dot_dimension_numbers<[1], [0], [0], [1], [0, 0, 1, 1], [], []>} : vector<32x1152xbf16>, vector<1152x256xbf16>, vector<32x256xf32> -> vector<32x256xf32>
    %c0_19 = arith.constant 0 : index
    %c0_20 = arith.constant 0 : index
    %57 = vector.load %arg3[%c0_19, %c0_20] : memref<1x256xf32, #tpu.memory_space<vmem>>, vector<1x256xf32>
    %58 = vector.broadcast %57 : vector<1x256xf32> to vector<32x256xf32>
    %59 = arith.addf %56, %58 : vector<32x256xf32>
    %cst_21 = arith.constant 0.000000e+00 : f32
    %60 = vector.broadcast %cst_21 : f32 to vector<32x256xf32>
    %61 = arith.maximumf %59, %60 : vector<32x256xf32>
    %62 = arith.truncf %61 : vector<32x256xf32> to vector<32x256xbf16>
    %c0_22 = arith.constant 0 : index
    %c0_23 = arith.constant 0 : index
    %63 = vector.load %arg4[%c0_22, %c0_23] : memref<256x128xbf16, #tpu.memory_space<vmem>>, vector<256x128xbf16>
    %cst_24 = arith.constant dense<0.000000e+00> : vector<32x128xf32>
    %64 = tpu.matmul %62, %63, %cst_24 {dimension_numbers = #tpu.dot_dimension_numbers<[1], [0], [0], [1], [0, 0, 1, 1], [], []>} : vector<32x256xbf16>, vector<256x128xbf16>, vector<32x128xf32> -> vector<32x128xf32>
    %c0_25 = arith.constant 0 : index
    %c0_26 = arith.constant 0 : index
    %65 = vector.load %arg5[%c0_25, %c0_26] : memref<1x128xf32, #tpu.memory_space<vmem>>, vector<1x128xf32>
    %66 = vector.broadcast %65 : vector<1x128xf32> to vector<32x128xf32>
    %67 = arith.addf %64, %66 : vector<32x128xf32>
    %cst_27 = arith.constant 0.000000e+00 : f32
    %68 = vector.broadcast %cst_27 : f32 to vector<32x128xf32>
    %69 = arith.maximumf %67, %68 : vector<32x128xf32>
    %70 = arith.addf %69, %1 : vector<32x128xf32>
    %71 = arith.truncf %70 : vector<32x128xf32> to vector<32x128xbf16>
    %c0_28 = arith.constant 0 : index
    %c0_29 = arith.constant 0 : index
    %72 = vector.load %arg6[%c0_28, %c0_29] : memref<32x128xbf16, #tpu.memory_space<vmem>>, vector<32x128xbf16>
    tpu.vector_store %arg6[%c0_28, %c0_29], %71 {strides = array<i32>} : memref<32x128xbf16, #tpu.memory_space<vmem>>, vector<32x128xbf16>,
    return
  }
  func.func @transform_0(%arg0: i32) -> (i32, i32) {
    %c0_i32 = arith.constant 0 : i32
    %c0_i32_0 = arith.constant 0 : i32
    %c0_i32_1 = arith.constant 0 : i32
    return %c0_i32, %c0_i32_0 : i32, i32
  }
  func.func @transform_1(%arg0: i32) -> (i32, i32) {
    %c0_i32 = arith.constant 0 : i32
    %c0_i32_0 = arith.constant 0 : i32
    %c0_i32_1 = arith.constant 0 : i32
    return %c0_i32, %c0_i32_0 : i32, i32
  }
  func.func @transform_2(%arg0: i32) -> (i32, i32) {
    %c0_i32 = arith.constant 0 : i32
    %c0_i32_0 = arith.constant 0 : i32
    %c0_i32_1 = arith.constant 0 : i32
    return %c0_i32, %c0_i32_0 : i32, i32
  }
  func.func @transform_3(%arg0: i32) -> (i32, i32) {
    %c0_i32 = arith.constant 0 : i32
    %c0_i32_0 = arith.constant 0 : i32
    %c0_i32_1 = arith.constant 0 : i32
    return %c0_i32, %c0_i32_0 : i32, i32
  }
  func.func @transform_4(%arg0: i32) -> (i32, i32) {
    %c0_i32 = arith.constant 0 : i32
    %c0_i32_0 = arith.constant 0 : i32
    %c0_i32_1 = arith.constant 0 : i32
    return %c0_i32, %c0_i32_0 : i32, i32
  }
  func.func @transform_5(%arg0: i32) -> (i32, i32) {
    %c0_i32 = arith.constant 0 : i32
    %c0_i32_0 = arith.constant 0 : i32
    %c0_i32_1 = arith.constant 0 : i32
    return %c0_i32, %c0_i32_0 : i32, i32
  }
}

</mosaic_0001>

<bundles_post_ra>
// kernel: tpu_custom_call.1
= control target key start
LH: loop header
LB: loop body
LE: loop exit
PB: predicated region body
PF: predicated region fallthrough
CT: control target
= control target key end

     0   :  { %10 = vsyncpa [#allocation3], 0  ;;  %s3220_s0 = inlined_call_operand.hbm [shape: bf16[32,128], index: 0, kind: input, shape index: {}]   ;;  %s3221_s1 = inlined_call_operand.hbm [shape: bf16[1152,256], index: 1, kind: input, shape index: {}]   ;;  %s3222_s2 = inlined_call_operand.hbm [shape: f32[1,256], index: 2, kind: input, shape index: {}]   ;;  %s3223_s3 = inlined_call_operand.hbm [shape: bf16[256,128], index: 3, kind: input, shape index: {}]   ;;  %s3224_s4 = inlined_call_operand.vmem [shape: f32[1,128], index: 4, kind: input, shape index: {}]   ;;  %s3225_s5 = inlined_call_operand.hbm [shape: bf16[32,128], index: 5, kind: output, shape index: {}]  }
   0x1   :  { %11 = vsyncpa [#allocation6], 0 }
   0x2   :  { %12 = vsyncpa [#allocation9], 0  ;;  %s31_s20 = sshll.u32 %s3221_s1, 4  ;;  %s32_s20 = int_to_ptr.hbm [resolvable:$true] %s31_s20 }
   0x3   :  { %13 = vsyncpa [#allocation4], 0  ;;  %s2820_s21 = smov [#allocation5]   ;;  %s18_s25 = sshll.u32 %s3220_s0, 4  ;;  %s19_s25 = int_to_ptr.hbm [resolvable:$true] %s18_s25 }
   0x4   :  { %s33_s22 = sshll.u32 %s2820_s21, 4  ;;  %s2821_s26 = smov 128   ;;  %s34_s22 = int_to_ptr.vmem [resolvable:$true] %s33_s22 }
   0x5   :  { %s2822_s27 = smov 8   ;;  %s2823_s28 = smov [#allocation2]  }
   0x6   :  { %39 = dma.hbm_to_vmem [thread:$0]  %s32_s20, 18432, %s34_s22, [#allocation6], %s2821_s26, %s2821_s26, %s2822_s27  }
   0x7   :  { %s20_s29 = sshll.u32 %s2823_s28, 4  ;;  %s2824_s30 = smov 64   ;;  %s21_s29 = int_to_ptr.vmem [resolvable:$true] %s20_s29 }
   0x8   :  { %s2825_s6 = smov 4   ;;  %s45_s8 = sshll.u32 %s3222_s2, 4  ;;  %s46_s8 = int_to_ptr.hbm [resolvable:$true] %s45_s8 }
   0x9   :  { %26 = dma.hbm_to_vmem [thread:$0]  %s19_s25, 256, %s21_s29, [#allocation3], %s2824_s30, %s2824_s30, %s2825_s6  }
   0xa   :  { %s2826_s0 = smov [#allocation7]   ;;  %s55_s12 = sshll.u32 %s3223_s3, 4  ;;  %s56_s12 = int_to_ptr.hbm [resolvable:$true] %s55_s12 }
   0xb   :  { %s47_s9 = sshll.u32 %s2826_s0, 4  ;;  %s2827_s13 = smov [#allocation8]   ;;  %s48_s9 = int_to_ptr.vmem [resolvable:$true] %s47_s9 }
   0xc   :  { %50 = dma.hbm_to_vmem [thread:$0]  %s46_s8, 32, %s48_s9, [#allocation6]  }
   0xd   :  { %s57_s14 = sshll.u32 %s2827_s13, 4  ;;  %s58_s14 = int_to_ptr.vmem [resolvable:$true] %s57_s14 }
   0xe   :  { %63 = dma.hbm_to_vmem [thread:$0]  %s56_s12, 2048, %s58_s14, [#allocation9], %s2824_s30, %s2824_s30, %s2825_s6  }
   0xf   :  { %2812 = dma.done.wait [#allocation3], 256  }
  0x10   :  { %2813 = vsyncadd [#allocation3], 4294967040 }
  0x11   :  { %2814 = dma.done.wait [#allocation6], 18464  }
  0x12   :  { %2815 = vsyncadd [#allocation6], 4294948832 }
  0x13   :  { %2816 = dma.done.wait [#allocation9], 2048  }
  0x14   :  { %2817 = vsyncadd [#allocation9], 4294965248  ;;  %v90_v0 = vlaneseq  ;;  %v2599_v4 = vld [vmem:[#allocation2] sm:$0xff]   ;;  %v2616_v5 = vld [vmem:[#allocation2 + $0x8] sm:$0xff]   ;;  %s2828_s2 = smov 120   ;;  %vm2829_vm6 = vmmov 1  }
  0x15   :  { %v2885_v6 = vunpack.c.l.bf16 %v2599_v4  ;;  %v2887_v7 = vunpack.c.h.bf16 %v2599_v4  ;;  %v2889_v8 = vunpack.c.h.bf16 %v2616_v5  ;;  %v2891_v9 = vunpack.c.l.bf16 %v2616_v5  ;;  %v1824_v10 = vld [vmem:[#allocation5 + $0xf0] sm:$0xf]  ;;  %v2469_v11 = vld [vmem:[#allocation5 + $0xf4] sm:$0xf0]  ;;  %v1816_v26 = vld [vmem:[#allocation5 + $0xe0] sm:$0xf] }
  0x16   :  { %v2881_v1 = vshrl.u32 %v90_v0, 7  ;;  %v1825_v13 = vor.u32 %v2469_v11, %v1824_v10  ;;  %v2467_v27 = vld [vmem:[#allocation5 + $0xe4] sm:$0xf0]  ;;  %v1808_v29 = vld [vmem:[#allocation5 + $0xd0] sm:$0xf]  ;;  %s1687_s19 = sshll.u32 %s3225_s5, 4  ;;  %s1688_s19 = int_to_ptr.hbm [resolvable:$true] %s1687_s19 }
  0x17   :  { %v145_v14 = vrot.slane %v2885_v6, 7  ;;  %v146_v15 = vrot.slane %v2887_v7, 7  ;;  %v148_v16 = vrot.slane %v2889_v8, 7  ;;  %v147_v18 = vrot.slane %v2891_v9, 7  ;;  %v2465_v33 = vld [vmem:[#allocation5 + $0xd4] sm:$0xf0] }
  0x18   :  { %v93_v2 = vadd.s32 16, %v2881_v1  ;;  %v99_v3 = vand.u32 15, %v2881_v1  ;;  %vm149_vm0 = vcmp.lt.s32.totalorder %v2881_v1, 1  ;;  %v2649_v19 = vpack.i.bf16 %v2887_v7, %v2885_v6  ;;  %1160 = vmatpush.bf16.msra.mxu1 %v1825_v13  ;;  %v1800_v40 = vld [vmem:[#allocation5 + $0xc0] sm:$0xf] }
  0x19   :  { %v92_v20 = vadd.s32 8, %v2881_v1  ;;  %v2907_v21 = vsel %vm149_vm0, %v145_v14, %v146_v15  ;;  %v2911_v22 = vsel %vm149_vm0, %v148_v16, %v145_v14  ;;  %v2918_v24 = vsel %vm149_vm0, %v146_v15, %v147_v18  ;;  %v1760_v41 = vld [vmem:[#allocation5 + $0x70] sm:$0xf]  ;;  %v2453_v45 = vld [vmem:[#allocation5 + $0x74] sm:$0xf0] }
  0x1a   :  { %v113_v12 = vand.u32 15, %v93_v2  ;;  %vm2897_vm1 = vcmp.ne.s32.totalorder %v99_v3, 0  ;;  %2650 = vrot.lane.b32.xlu2 %v2649_v19, %s2828_s2  ;;  %v212_v30 = vrot.slane %v2885_v6, 1  ;;  %v214_v31 = vrot.slane %v2891_v9, 1  ;;  %v1888_v46 = vld [vmem:[#allocation5 + $0x170] sm:$0xf] }
  0x1b   :  { %v158_v23 = vsel %vm2897_vm1, %v2911_v22, 0.0  ;;  %v106_v32 = vand.u32 15, %v92_v20  ;;  %v2932_v34 = vsel %vm149_vm0, %v147_v18, %v148_v16  ;;  %v213_v36 = vrot.slane %v2887_v7, 1  ;;  %v2485_v47 = vld [vmem:[#allocation5 + $0x174] sm:$0xf0]  ;;  %vm3000_vm7 = vmpackc.low %vm2829_vm6, %vm2897_vm1 }
  0x1c   :  { %vm2920_vm2 = vcmp.ne.s32.totalorder %v113_v12, 0  ;;  %v2639_v28 = vpack.i.bf16 %v2907_v21, %v158_v23  ;;  %v1817_v37 = vor.u32 %v2467_v27, %v1816_v26  ;;  %v94_v39 = vadd.s32 24, %v2881_v1  ;;  %v2463_v50 = vld [vmem:[#allocation5 + $0xc4] sm:$0xf0]  ;;  %v1752_v51 = vld [vmem:[#allocation5 + $0x60] sm:$0xf] }
  0x1d   :  { %v160_v35 = vsel %vm2920_vm2, %v2918_v24, 0.0  ;;  %vm216_vm3 = vcmp.lt.s32.totalorder %v2881_v1, 7  ;;  %v1809_v44 = vor.u32 %v2465_v33, %v1808_v29  ;;  %vm2949_vm4 = vcmp.ne.s32.totalorder %v106_v32, 15  ;;  %v2451_v52 = vld [vmem:[#allocation5 + $0x64] sm:$0xf0]  ;;  %vm3014_vm8 = vmpackc.low %vm2829_vm6, %vm2920_vm2 }
  0x1e   :  { %2640 = vrot.lane.b32.xlu1 %v2639_v28, %s2828_s2  ;;  %2630 = vrot.lane.b32.xlu0 %v2639_v28, %s2822_s27  ;;  %v2654_v38 = vpack.i.bf16 %v2932_v34, %v160_v35  ;;  %v218_v42 = vsel %vm216_vm3, %v213_v36, %v214_v31  ;;  %v219_v43 = vsel %vm216_vm3, %v212_v30, %v213_v36  ;;  %v1880_v53 = vld [vmem:[#allocation5 + $0x160] sm:$0xf]  ;;  %v2483_v54 = vld [vmem:[#allocation5 + $0x164] sm:$0xf0]  ;;  %v120_v55 = vand.u32 15, %v94_v39  ;;  %vm3094_vm13 = vmpackc.low %vm2949_vm4, %vm2829_vm6 }
  0x1f   :  { %1161 = vmatpush.bf16.msra.mxu1 %v1817_v37  ;;  %v2953_v49 = vpack.c.bf16 %v218_v42, %v219_v43  ;;  %v1761_v56 = vor.u32 %v2453_v45, %v1760_v41  ;;  %v1889_v57 = vor.u32 %v2485_v47, %v1888_v46  ;;  %v215_v58 = vrot.slane %v2889_v8, 1  ;;  %v1792_v61 = vld [vmem:[#allocation5 + $0xb0] sm:$0xf]  ;;  %v2461_v62 = vld [vmem:[#allocation5 + $0xb4] sm:$0xf0] }
  0x20   :  { %v226_v59 = vsel %vm2949_vm4, %v218_v42, 0.0  ;;  %v1801_v60 = vor.u32 %v2463_v50, %v1800_v40  ;;  %v1753_v63 = vor.u32 %v2451_v52, %v1752_v51  ;;  %v1881_v2 = vor.u32 %v2483_v54, %v1880_v53  ;;  %v1744_v3 = vld [vmem:[#allocation5 + $0x50] sm:$0xf]  ;;  %v2501_v5 = vld [vmem:[#allocation5 + $0x1f4] sm:$0xf0] }
  0x21   :  { %1141 = vmatpush.bf16.msra.mxu0 %v1761_v56  ;;  %1179 = vmatpush.bf16.msra.mxu2 %v1889_v57  ;;  %v1952_v4 = vld [vmem:[#allocation5 + $0x1f0] sm:$0xf]  ;;  %v2449_v10 = vld [vmem:[#allocation5 + $0x54] sm:$0xf0]  ;;  %v2961_v14 = vpack.i.bf16 %v226_v59, %v219_v43  ;;  %v1944_v15 = vld [vmem:[#allocation5 + $0x1e0] sm:$0xf]  ;;  %v1793_v18 = vor.u32 %v2461_v62, %v1792_v61  ;;  %v2664_v32 = vpack.i.bf16 %v2889_v8, %v2891_v9 }
  0x22   :  { %2655 = vrot.lane.b32.xlu2 %v2654_v38, %s2828_s2  ;;  %v1872_v11 = vld [vmem:[#allocation5 + $0x150] sm:$0xf]  ;;  %v2481_v12 = vld [vmem:[#allocation5 + $0x154] sm:$0xf0]  ;;  %v1953_v13 = vor.u32 %v2501_v5, %v1952_v4  ;;  %vm2963_vm5 = vcmp.ne.s32.totalorder %v120_v55, 15  ;;  %v2973_v33 = vsel %vm216_vm3, %v215_v58, %v212_v30  ;;  %v2986_v47 = vsel %vm216_vm3, %v214_v31, %v215_v58 }
  0x23   :  { %1162 = vmatpush.bf16.msra.mxu1 %v1809_v44  ;;  %v2499_v20 = vld [vmem:[#allocation5 + $0x1e4] sm:$0xf0]  ;;  %v1784_v23 = vld [vmem:[#allocation5 + $0xa0] sm:$0xf]  ;;  %v1873_v27 = vor.u32 %v2481_v12, %v1872_v11  ;;  %v1776_v39 = vld [vmem:[#allocation5 + $0x90] sm:$0xf] }
  0x24   :  { %1198 = vmatpush.bf16.msra.mxu3 %v1953_v13  ;;  %v2459_v26 = vld [vmem:[#allocation5 + $0xa4] sm:$0xf0]  ;;  %v1736_v28 = vld [vmem:[#allocation5 + $0x40] sm:$0xf]  ;;  %v1945_v29 = vor.u32 %v2499_v20, %v1944_v15  ;;  %v1936_v40 = vld [vmem:[#allocation5 + $0x1d0] sm:$0xf] }
  0x25   :  { %1142 = vmatpush.bf16.msra.mxu0 %v1753_v63  ;;  %1180 = vmatpush.bf16.msra.mxu2 %v1881_v2  ;;  %v2447_v35 = vld [vmem:[#allocation5 + $0x44] sm:$0xf0]  ;;  %v1864_v36 = vld [vmem:[#allocation5 + $0x140] sm:$0xf]  ;;  %v2497_v41 = vld [vmem:[#allocation5 + $0x1d4] sm:$0xf0] }
  0x26   :  { %2645 = vrot.lane.b32.xlu1 %v2649_v19, %s2822_s27  ;;  %2635 = vrot.lane.b32.xlu0 %v2654_v38, %s2822_s27  ;;  %v1745_v19 = vor.u32 %v2449_v10, %v1744_v3  ;;  %v2479_v37 = vld [vmem:[#allocation5 + $0x144] sm:$0xf0]  ;;  %v1785_v38 = vor.u32 %v2459_v26, %v1784_v23  ;;  %v228_v42 = vsel %vm2963_vm5, %v2973_v33, 0.0  ;;  %v2457_v43 = vld [vmem:[#allocation5 + $0x94] sm:$0xf0]  ;;  %v1737_v30 = vor.u32 %v2447_v35, %v1736_v28  ;;  %vm3119_vm14 = vmpackc.low %vm2963_vm5, %vm2829_vm6 }
  0x27   :  { %1163 = vmatpush.bf16.msra.mxu1 %v1801_v60  ;;  %v1865_v44 = vor.u32 %v2479_v37, %v1864_v36  ;;  %v1728_v45 = vld [vmem:[#allocation5 + $0x30] sm:$0xf]  ;;  %v1937_v46 = vor.u32 %v2497_v41, %v1936_v40  ;;  %v2445_v50 = vld [vmem:[#allocation5 + $0x34] sm:$0xf0]  ;;  %v2684_v53 = vpack.i.bf16 %v228_v42, %v2986_v47  ;;  %v1928_v54 = vld [vmem:[#allocation5 + $0x1c0] sm:$0xf]  ;;  %v1777_v56 = vor.u32 %v2457_v43, %v1776_v39 }
  0x28   :  { %1199 = vmatpush.bf16.msra.mxu3 %v1945_v29  ;;  %v1856_v51 = vld [vmem:[#allocation5 + $0x130] sm:$0xf]  ;;  %v2477_v52 = vld [vmem:[#allocation5 + $0x134] sm:$0xf0]  ;;  %v2495_v55 = vld [vmem:[#allocation5 + $0x1c4] sm:$0xf0]  ;;  %v1729_v1 = vor.u32 %v2445_v50, %v1728_v45 }
  0x29   :  { %1143 = vmatpush.bf16.msra.mxu0 %v1745_v19  ;;  %1181 = vmatpush.bf16.msra.mxu2 %v1873_v27  ;;  %v1768_v57 = vld [vmem:[#allocation5 + $0x80] sm:$0xf]  ;;  %v2455_v59 = vld [vmem:[#allocation5 + $0x84] sm:$0xf0]  ;;  %v1929_v60 = vor.u32 %v2495_v55, %v1928_v54  ;;  %v2080_v61 = vld [vmem:[#allocation5 + $0x2f0] sm:$0xf]  ;;  %v1857_v31 = vor.u32 %v2477_v52, %v1856_v51  ;;  %v2995_v19 = vpack.c.bf16 %v2907_v21, %v2911_v22 }
  0x2a   :  { %2670 = vrot.lane.b32.xlu2 %v2961_v14, %s2822_s27  ;;  %v2533_v62 = vld [vmem:[#allocation5 + $0x2f4] sm:$0xf0]  ;;  %v1920_v58 = vld [vmem:[#allocation5 + $0x1b0] sm:$0xf]  ;;  %v1720_v63 = vld [vmem:[#allocation5 + $0x20] sm:$0xf]  ;;  %v1769_v10 = vor.u32 %v2455_v59, %v1768_v57 }
  0x2b   :  { %1164 = vmatpush.bf16.msra.mxu1 %v1793_v18  ;;  %v2443_v2 = vld [vmem:[#allocation5 + $0x24] sm:$0xf0]  ;;  %v2493_v3 = vld [vmem:[#allocation5 + $0x1b4] sm:$0xf0]  ;;  %v1848_v4 = vld [vmem:[#allocation5 + $0x120] sm:$0xf]  ;;  %v2081_v12 = vor.u32 %v2533_v62, %v2080_v61 }
  0x2c   :  { %1200 = vmatpush.bf16.msra.mxu3 %v1937_v46  ;;  %v2475_v5 = vld [vmem:[#allocation5 + $0x124] sm:$0xf0]  ;;  %v1921_v11 = vor.u32 %v2493_v3, %v1920_v58  ;;  %v2072_v13 = vld [vmem:[#allocation5 + $0x2e0] sm:$0xf]  ;;  %v1721_v15 = vor.u32 %v2443_v2, %v1720_v63  ;;  %v1712_v23 = vld [vmem:[#allocation5 + $0x10] sm:$0xf] }
  0x2d   :  { %1144 = vmatpush.bf16.msra.mxu0 %v1737_v30  ;;  %1182 = vmatpush.bf16.msra.mxu2 %v1865_v44  ;;  %v2531_v18 = vld [vmem:[#allocation5 + $0x2e4] sm:$0xf0]  ;;  %v1849_v20 = vor.u32 %v2475_v5, %v1848_v4  ;;  %v2441_v26 = vld [vmem:[#allocation5 + $0x14] sm:$0xf0]  ;;  %v1840_v27 = vld [vmem:[#allocation5 + $0x110] sm:$0xf]  ;;  %v3009_v30 = vpack.c.bf16 %v2932_v34, %v2918_v24 }
  0x2e   :  { %2665 = vrot.lane.b32.xlu1 %v2664_v32, %s2828_s2  ;;  %2660 = vrot.lane.b32.xlu0 %v2664_v32, %s2822_s27  ;;  %v2473_v28 = vld [vmem:[#allocation5 + $0x114] sm:$0xf0]  ;;  %v1713_v32 = vor.u32 %v2441_v26, %v1712_v23  ;;  %v2064_v35 = vld [vmem:[#allocation5 + $0x2d0] sm:$0xf]  ;;  %v2056_v22 = vld [vmem:[#allocation5 + $0x2c0] sm:$0xf] }
  0x2f   :  { %1165 = vmatpush.bf16.msra.mxu1 %v1785_v38  ;;  %v2529_v36 = vld [vmem:[#allocation5 + $0x2d4] sm:$0xf0]  ;;  %v1841_v21 = vor.u32 %v2473_v28, %v1840_v27  ;;  %v2527_v37 = vld [vmem:[#allocation5 + $0x2c4] sm:$0xf0]  ;;  %v2048_v39 = vld [vmem:[#allocation5 + $0x2b0] sm:$0xf] }
  0x30   :  { %1201 = vmatpush.bf16.msra.mxu3 %v1929_v60  ;;  %v2065_v17 = vor.u32 %v2529_v36, %v2064_v35  ;;  %v2057_v38 = vor.u32 %v2527_v37, %v2056_v22  ;;  %v2525_v40 = vld [vmem:[#allocation5 + $0x2b4] sm:$0xf0]  ;;  %v2040_v42 = vld [vmem:[#allocation5 + $0x2a0] sm:$0xf]  ;;  %v2523_v43 = vld [vmem:[#allocation5 + $0x2a4] sm:$0xf0] }
  0x31   :  { %1145 = vmatpush.bf16.msra.mxu0 %v1729_v1  ;;  %1183 = vmatpush.bf16.msra.mxu2 %v1857_v31  ;;  %v2049_v41 = vor.u32 %v2525_v40, %v2048_v39  ;;  %v2041_v45 = vor.u32 %v2523_v43, %v2040_v42  ;;  %v2032_v46 = vld [vmem:[#allocation5 + $0x290] sm:$0xf]  ;;  %v2521_v50 = vld [vmem:[#allocation5 + $0x294] sm:$0xf0]  ;;  %v3022_v24 = vand.u32 127, %v90_v0 }
  0x32   :  { %2685 = vrot.lane.b32.xlu2 %v2684_v53, %s2828_s2  ;;  %v2033_v51 = vor.u32 %v2521_v50, %v2032_v46  ;;  %v1704_v25 = vld [vmem:[#allocation5] sm:$0xf]  ;;  %v2439_v34 = vld [vmem:[#allocation5 + $0x4] sm:$0xf0]  ;;  %v2016_v1 = vld [vmem:[#allocation5 + $0x270] sm:$0xf] }
  0x33   :  { %1166 = vmatpush.bf16.msra.mxu1 %v1777_v56  ;;  %v1832_v52 = vld [vmem:[#allocation5 + $0x100] sm:$0xf]  ;;  %v2471_v54 = vld [vmem:[#allocation5 + $0x104] sm:$0xf0]  ;;  %vm183_vm9 = vcmp.lt.s32.totalorder %v3022_v24, 120  ;;  %vm170_vm11 = vcmp.ge.s32.totalorder %v3022_v24, 8 }
  0x34   :  { %1202 = vmatpush.bf16.msra.mxu3 %v1921_v11  ;;  %v1912_v55 = vld [vmem:[#allocation5 + $0x1a0] sm:$0xf]  ;;  %v2491_v56 = vld [vmem:[#allocation5 + $0x1a4] sm:$0xf0]  ;;  %v1833_v57 = vor.u32 %v2471_v54, %v1832_v52  ;;  %v2517_v0 = vld [vmem:[#allocation5 + $0x274] sm:$0xf0] }
  0x35   :  { %1146 = vmatpush.bf16.msra.mxu0 %v1721_v15  ;;  %1184 = vmatpush.bf16.msra.mxu2 %v1849_v20  ;;  %v1913_v59 = vor.u32 %v2491_v56, %v1912_v55  ;;  %v2024_v60 = vld [vmem:[#allocation5 + $0x280] sm:$0xf]  ;;  %v2519_v61 = vld [vmem:[#allocation5 + $0x284] sm:$0xf0]  ;;  %v1904_v31 = vld [vmem:[#allocation5 + $0x190] sm:$0xf]  ;;  %v2017_v58 = vor.u32 %v2517_v0, %v2016_v1 }
  0x36   :  { %2680 = vrot.lane.b32.xlu1 %v2684_v53, %s2822_s27  ;;  %2675 = vrot.lane.b32.xlu0 %v2961_v14, %s2828_s2  ;;  %v2073_v14 = vor.u32 %v2531_v18, %v2072_v13  ;;  %v1705_v53 = vor.u32 %v2439_v34, %v1704_v25  ;;  %v2025_v62 = vor.u32 %v2519_v61, %v2024_v60  ;;  %v2489_v63 = vld [vmem:[#allocation5 + $0x194] sm:$0xf0]  ;;  %v2144_v2 = vld [vmem:[#allocation5 + $0x370] sm:$0xf]  ;;  %v2452_v11 = vld [vmem:[#allocation5 + $0x74] sm:$0xf] }
  0x37   :  { %1167 = vmatpush.bf16.msra.mxu1 %v1769_v10  ;;  %v2549_v3 = vld [vmem:[#allocation5 + $0x374] sm:$0xf0]  ;;  %v1905_v5 = vor.u32 %v2489_v63, %v1904_v31  ;;  %vm3028_vm10 = vmpackc.low %vm183_vm9, %vm183_vm9  ;;  %v2008_v23 = vld [vmem:[#allocation5 + $0x260] sm:$0xf] }
  0x38   :  { %1203 = vmatpush.bf16.msra.mxu3 %v1913_v59  ;;  %v2145_v10 = vor.u32 %v2549_v3, %v2144_v2  ;;  %v2515_v26 = vld [vmem:[#allocation5 + $0x264] sm:$0xf0]  ;;  %v1896_v27 = vld [vmem:[#allocation5 + $0x180] sm:$0xf]  ;;  %v2450_v22 = vld [vmem:[#allocation5 + $0x64] sm:$0xf] }
  0x39   :  { %1147 = vmatpush.bf16.msra.mxu0 %v1713_v32  ;;  %1185 = vmatpush.bf16.msra.mxu2 %v1841_v21  ;;  %v2487_v32 = vld [vmem:[#allocation5 + $0x184] sm:$0xf0]  ;;  %v2136_v35 = vld [vmem:[#allocation5 + $0x360] sm:$0xf]  ;;  %v1754_v37 = vld [vmem:[#allocation5 + $0x68] sm:$0xf0] }
  0x3a   :  { %2286 = vmatmul.msk.bf16.vlgmr.msra.gmra.mxu1 %vm3000_vm7, %v2995_v19  ;;  %v2547_v36 = vld [vmem:[#allocation5 + $0x364] sm:$0xf0]  ;;  %v1897_v21 = vor.u32 %v2487_v32, %v1896_v27  ;;  %v2000_v39 = vld [vmem:[#allocation5 + $0x250] sm:$0xf]  ;;  %v2513_v40 = vld [vmem:[#allocation5 + $0x254] sm:$0xf0] }
  0x3b   :  { %1236 = vmatpush.bf16.msrb.mxu1 %v2081_v12  ;;  %v1762_v12 = vld [vmem:[#allocation5 + $0x78] sm:$0xf0]  ;;  %v2001_v42 = vor.u32 %v2513_v40, %v2000_v39  ;;  %v2545_v43 = vld [vmem:[#allocation5 + $0x354] sm:$0xf0]  ;;  %v2448_v25 = vld [vmem:[#allocation5 + $0x54] sm:$0xf] }
  0x3c   :  { %v1765_v20 = vor.u32 %v2452_v11, %v1762_v12  ;;  %1204 = vmatpush.bf16.msra.mxu3 %v1905_v5  ;;  %v2565_v46 = vld [vmem:[#allocation5 + $0x3f4] sm:$0xf0]  ;;  %v1746_v34 = vld [vmem:[#allocation5 + $0x58] sm:$0xf0]  ;;  %v2511_v54 = vld [vmem:[#allocation5 + $0x244] sm:$0xf0] }
  0x3d   :  { %1148 = vmatpush.bf16.msra.mxu0 %v1705_v53  ;;  %1186 = vmatpush.bf16.msra.mxu2 %v1833_v57  ;;  %v1749_v52 = vor.u32 %v2448_v25, %v1746_v34  ;;  %v1992_v53 = vld [vmem:[#allocation5 + $0x240] sm:$0xf]  ;;  %v2543_v57 = vld [vmem:[#allocation5 + $0x344] sm:$0xf0]  ;;  %v2446_v1 = vld [vmem:[#allocation5 + $0x44] sm:$0xf] }
  0x3e   :  { %v2120_v55 = vld [vmem:[#allocation5 + $0x340] sm:$0xf]  ;;  %v1993_v56 = vor.u32 %v2511_v54, %v1992_v53  ;;  %v2563_v60 = vld [vmem:[#allocation5 + $0x3e4] sm:$0xf0]  ;;  %v1738_v0 = vld [vmem:[#allocation5 + $0x48] sm:$0xf0] }
  0x3f   :  { %1237 = vmatpush.bf16.msrb.mxu1 %v2073_v14  ;;  %v2009_v14 = vor.u32 %v2515_v26, %v2008_v23  ;;  %v2200_v59 = vld [vmem:[#allocation5 + $0x3e0] sm:$0xf]  ;;  %v2121_v61 = vor.u32 %v2543_v57, %v2120_v55  ;;  %v1741_v31 = vor.u32 %v2446_v1, %v1738_v0  ;;  %v2509_v63 = vld [vmem:[#allocation5 + $0x234] sm:$0xf0]  ;;  %v2112_v3 = vld [vmem:[#allocation5 + $0x330] sm:$0xf] }
  0x40   :  { %1205 = vmatpush.bf16.msra.mxu3 %v1897_v21  ;;  %v2192_v5 = vld [vmem:[#allocation5 + $0x3d0] sm:$0xf]  ;;  %v2561_v11 = vld [vmem:[#allocation5 + $0x3d4] sm:$0xf0]  ;;  %v2444_v12 = vld [vmem:[#allocation5 + $0x34] sm:$0xf] }
  0x41   :  { %1217 = vmatpush.bf16.msrb.mxu0 %v2017_v58  ;;  %1255 = vmatpush.bf16.msrb.mxu2 %v2145_v10  ;;  %v1984_v58 = vld [vmem:[#allocation5 + $0x230] sm:$0xf]  ;;  %v1976_v23 = vld [vmem:[#allocation5 + $0x220] sm:$0xf]  ;;  %v2507_v26 = vld [vmem:[#allocation5 + $0x224] sm:$0xf0] }
  0x42   :  { %v1985_v2 = vor.u32 %v2509_v63, %v1984_v58  ;;  %v2104_v27 = vld [vmem:[#allocation5 + $0x320] sm:$0xf]  ;;  %v2539_v32 = vld [vmem:[#allocation5 + $0x324] sm:$0xf0]  ;;  %v1968_v39 = vld [vmem:[#allocation5 + $0x210] sm:$0xf] }
  0x43   :  { %1238 = vmatpush.bf16.msrb.mxu1 %v2065_v17  ;;  %v2137_v17 = vor.u32 %v2547_v36, %v2136_v35  ;;  %v2184_v35 = vld [vmem:[#allocation5 + $0x3c0] sm:$0xf]  ;;  %v2559_v36 = vld [vmem:[#allocation5 + $0x3c4] sm:$0xf0]  ;;  %v2105_v21 = vor.u32 %v2539_v32, %v2104_v27  ;;  %v2505_v40 = vld [vmem:[#allocation5 + $0x214] sm:$0xf0] }
  0x44   :  { %v2440_v25 = vld [vmem:[#allocation5 + $0x14] sm:$0xf]  ;;  %v1714_v34 = vld [vmem:[#allocation5 + $0x18] sm:$0xf0]  ;;  %v2503_v54 = vld [vmem:[#allocation5 + $0x204] sm:$0xf0] }
  0x45   :  { %1218 = vmatpush.bf16.msrb.mxu0 %v2009_v14  ;;  %1256 = vmatpush.bf16.msrb.mxu2 %v2137_v17  ;;  %v1977_v14 = vor.u32 %v2507_v26, %v1976_v23  ;;  %v2185_v17 = vor.u32 %v2559_v36, %v2184_v35  ;;  %v1717_v53 = vor.u32 %v2440_v25, %v1714_v34  ;;  %v2088_v55 = vld [vmem:[#allocation5 + $0x300] sm:$0xf]  ;;  %v2555_v1 = vld [vmem:[#allocation5 + $0x3a4] sm:$0xf0]  ;;  %v2438_v0 = vld [vmem:[#allocation5 + $0x4] sm:$0xf] }
  0x46   :  { %vm3041_vm12 = vmpackc.low %vm170_vm11, %vm170_vm11  ;;  %v2553_v23 = vld [vmem:[#allocation5 + $0x394] sm:$0xf0]  ;;  %v2468_v26 = vld [vmem:[#allocation5 + $0xf4] sm:$0xf] }
  0x47   :  { %1239 = vmatpush.bf16.msrb.mxu1 %v2057_v38  ;;  %v1757_v38 = vor.u32 %v2450_v22, %v1754_v37  ;;  %v2442_v22 = vld [vmem:[#allocation5 + $0x24] sm:$0xf]  ;;  %v1722_v37 = vld [vmem:[#allocation5 + $0x28] sm:$0xf0]  ;;  %v1826_v27 = vld [vmem:[#allocation5 + $0xf8] sm:$0xf0] }
  0x48   :  { %v1829_v32 = vor.u32 %v2468_v26, %v1826_v27  ;;  %v2516_v35 = vld [vmem:[#allocation5 + $0x274] sm:$0xf]  ;;  %v2018_v36 = vld [vmem:[#allocation5 + $0x278] sm:$0xf0]  ;;  %v2010_v34 = vld [vmem:[#allocation5 + $0x268] sm:$0xf0] }
  0x49   :  { %1219 = vmatpush.bf16.msrb.mxu0 %v2001_v42  ;;  %v1969_v42 = vor.u32 %v2505_v40, %v1968_v39  ;;  %v2194_v29 = vld [vmem:[#allocation5 + $0x3d8] sm:$0xf0]  ;;  %v2154_v44 = vld [vmem:[#allocation5 + $0x388] sm:$0xf0] }
  0x4a   :  { %2289 = vmatmul.msk.bf16.gmra.mxu1 %vm3014_vm8, %v3009_v30 }
  0x4b   :  { %1240 = vmatpush.bf16.msrb.mxu1 %v2049_v41  ;;  %v2128_v41 = vld [vmem:[#allocation5 + $0x350] sm:$0xf] }
  0x4c   :  { %v2129_v50 = vor.u32 %v2545_v43, %v2128_v41  ;;  %v2096_v41 = vld [vmem:[#allocation5 + $0x310] sm:$0xf]  ;;  %v2537_v43 = vld [vmem:[#allocation5 + $0x314] sm:$0xf0] }
  0x4d   :  { %1220 = vmatpush.bf16.msrb.mxu0 %v1993_v56  ;;  %v2535_v56 = vld [vmem:[#allocation5 + $0x304] sm:$0xf0] }
  0x4e   :  { %1257 = vmatpush.bf16.msrb.mxu2 %v2129_v50  ;;  %v2097_v50 = vor.u32 %v2537_v43, %v2096_v41  ;;  %v2466_v43 = vld [vmem:[#allocation5 + $0xe4] sm:$0xf] }
  0x4f   :  { %1241 = vmatpush.bf16.msrb.mxu1 %v2041_v45  ;;  %v2208_v45 = vld [vmem:[#allocation5 + $0x3f0] sm:$0xf] }
  0x51   :  { %1221 = vmatpush.bf16.msrb.mxu0 %v1985_v2 }
  0x52   :  { %1258 = vmatpush.bf16.msrb.mxu2 %v2121_v61  ;;  %v2089_v61 = vor.u32 %v2535_v56, %v2088_v55  ;;  %v2256_v56 = vld [vmem:[#allocation5 + $0x450] sm:$0xf] }
  0x53   :  { %1242 = vmatpush.bf16.msrb.mxu1 %v2033_v51  ;;  %v2209_v51 = vor.u32 %v2565_v46, %v2208_v45  ;;  %v2176_v45 = vld [vmem:[#allocation5 + $0x3b0] sm:$0xf]  ;;  %v2557_v46 = vld [vmem:[#allocation5 + $0x3b4] sm:$0xf0] }
  0x55   :  { %1274 = vmatpush.bf16.msrb.mxu3 %v2209_v51  ;;  %1222 = vmatpush.bf16.msrb.mxu0 %v1977_v14  ;;  %v2177_v51 = vor.u32 %v2557_v46, %v2176_v45  ;;  %v1818_v45 = vld [vmem:[#allocation5 + $0xe8] sm:$0xf0]  ;;  %v2514_v46 = vld [vmem:[#allocation5 + $0x264] sm:$0xf] }
  0x57   :  { %1243 = vmatpush.bf16.msrb.mxu1 %v2025_v62  ;;  %v2201_v62 = vor.u32 %v2563_v60, %v2200_v59 }
  0x59   :  { %1275 = vmatpush.bf16.msrb.mxu3 %v2201_v62  ;;  %1223 = vmatpush.bf16.msrb.mxu0 %v1969_v42  ;;  %v2168_v62 = vld [vmem:[#allocation5 + $0x3a0] sm:$0xf] }
  0x5b   :  { %1312 = vmatpush.bf16.msra.mxu1 %v1765_v20 }
  0x5f   :  { %1313 = vmatpush.bf16.msra.mxu1 %v1757_v38  ;;  %v1725_v38 = vor.u32 %v2442_v22, %v1722_v37  ;;  %v2579_v22 = vld [vmem:[#allocation5 + $0x464] sm:$0xf0]  ;;  %v2152_v37 = vld [vmem:[#allocation5 + $0x380] sm:$0xf] }
  0x63   :  { %1314 = vmatpush.bf16.msra.mxu1 %v1749_v52  ;;  %v1960_v52 = vld [vmem:[#allocation5 + $0x200] sm:$0xf] }
  0x64   :  { %v1961_v60 = vor.u32 %v2503_v54, %v1960_v52  ;;  %v1821_v52 = vor.u32 %v2466_v43, %v1818_v45  ;;  %v2573_v43 = vld [vmem:[#allocation5 + $0x434] sm:$0xf0]  ;;  %v2460_v45 = vld [vmem:[#allocation5 + $0xb4] sm:$0xf] }
  0x66   :  { %1224 = vmatpush.bf16.msrb.mxu0 %v1961_v60 }
  0x67   :  { %1315 = vmatpush.bf16.msra.mxu1 %v1741_v31 }
  0x74   :  { %v2651_v4 = vpop.permute.xlu2 %2650 }
  0x75   :  { %v2653_v15 = vunpack.i.h.bf16 %v2651_v4  ;;  %v2652_v18 = vunpack.i.l.bf16 %v2651_v4  ;;  %v2541_v4 = vld [vmem:[#allocation5 + $0x334] sm:$0xf0] }
  0x76   :  { %v2113_v10 = vor.u32 %v2541_v4, %v2112_v3  ;;  %v1706_v3 = vld [vmem:[#allocation5 + $0x8] sm:$0xf0] }
  0x77   :  { %v3032_v28 = vpack.c.bf16 %v2653_v15, %v2652_v18  ;;  %v1730_v15 = vld [vmem:[#allocation5 + $0x38] sm:$0xf0]  ;;  %v2193_v18 = vor.u32 %v2561_v11, %v2192_v5  ;;  %v2169_v5 = vor.u32 %v2555_v1, %v2168_v62 }
  0x78   :  { %v1733_v20 = vor.u32 %v2444_v12, %v1730_v15  ;;  %1259 = vmatpush.bf16.msrb.mxu2 %v2113_v10  ;;  %v1709_v10 = vor.u32 %v2438_v0, %v1706_v3  ;;  %v2272_v15 = vld [vmem:[#allocation5 + $0x470] sm:$0xf]  ;;  %v1810_v0 = vld [vmem:[#allocation5 + $0xd8] sm:$0xf0]  ;;  %v2512_v3 = vld [vmem:[#allocation5 + $0x254] sm:$0xf] }
  0x79   :  { %2304 = vmatmul.msk.bf16.vlgmr.msrb.gmra.mxu1 %vm3028_vm10, %v3032_v28  ;;  %1276 = vmatpush.bf16.msrb.mxu3 %v2193_v18  ;;  %v2581_v18 = vld [vmem:[#allocation5 + $0x474] sm:$0xf0] }
  0x7a   :  { %1316 = vmatpush.bf16.msra.mxu1 %v1733_v20  ;;  %v2160_v20 = vld [vmem:[#allocation5 + $0x390] sm:$0xf]  ;;  %v2273_v24 = vor.u32 %v2581_v18, %v2272_v15  ;;  %v2575_v18 = vld [vmem:[#allocation5 + $0x444] sm:$0xf0] }
  0x7b   :  { %v2161_v14 = vor.u32 %v2553_v23, %v2160_v20  ;;  %v2462_v20 = vld [vmem:[#allocation5 + $0xc4] sm:$0xf] }
  0x7c   :  { %1260 = vmatpush.bf16.msrb.mxu2 %v2105_v21  ;;  %v2264_v21 = vld [vmem:[#allocation5 + $0x460] sm:$0xf]  ;;  %v2656_v25 = vpop.permute.xlu2 %2655 }
  0x7d   :  { %1277 = vmatpush.bf16.msrb.mxu3 %v2185_v17  ;;  %v2021_v17 = vor.u32 %v2516_v35, %v2018_v36  ;;  %v2265_v41 = vor.u32 %v2579_v22, %v2264_v21  ;;  %v2658_v55 = vunpack.i.h.bf16 %v2656_v25  ;;  %v2657_v60 = vunpack.i.l.bf16 %v2656_v25  ;;  %v2510_v35 = vld [vmem:[#allocation5 + $0x244] sm:$0xf]  ;;  %v1794_v25 = vld [vmem:[#allocation5 + $0xb8] sm:$0xf0] }
  0x7e   :  { %1317 = vmatpush.bf16.msra.mxu1 %v1725_v38  ;;  %v2551_v38 = vld [vmem:[#allocation5 + $0x384] sm:$0xf0] }
  0x7f   :  { %v2153_v42 = vor.u32 %v2551_v38, %v2152_v37  ;;  %v3060_v36 = vpack.c.bf16 %v2658_v55, %v2657_v60  ;;  %v1994_v37 = vld [vmem:[#allocation5 + $0x248] sm:$0xf0] }
  0x80   :  { %1261 = vmatpush.bf16.msrb.mxu2 %v2097_v50 }
  0x81   :  { %1278 = vmatpush.bf16.msrb.mxu3 %v2177_v51 }
  0x82   :  { %1318 = vmatpush.bf16.msra.mxu1 %v1717_v53  ;;  %v2013_v53 = vor.u32 %v2514_v46, %v2010_v34  ;;  %v2480_v34 = vld [vmem:[#allocation5 + $0x154] sm:$0xf] }
  0x84   :  { %1262 = vmatpush.bf16.msrb.mxu2 %v2089_v61 }
  0x85   :  { %1279 = vmatpush.bf16.msrb.mxu3 %v2169_v5  ;;  %v2002_v5 = vld [vmem:[#allocation5 + $0x258] sm:$0xf0] }
  0x86   :  { %1319 = vmatpush.bf16.msra.mxu1 %v1709_v10  ;;  %v2248_v10 = vld [vmem:[#allocation5 + $0x440] sm:$0xf]  ;;  %v2005_v15 = vor.u32 %v2512_v3, %v2002_v5 }
  0x87   :  { %v2249_v26 = vor.u32 %v2575_v18, %v2248_v10  ;;  %v1978_v10 = vld [vmem:[#allocation5 + $0x228] sm:$0xf0] }
  0x89   :  { %1280 = vmatpush.bf16.msrb.mxu3 %v2161_v14  ;;  %v2482_v14 = vld [vmem:[#allocation5 + $0x164] sm:$0xf] }
  0x8a   :  { %1388 = vmatpush.bf16.msrb.mxu1 %v2021_v17 }
  0x8d   :  { %1281 = vmatpush.bf16.msrb.mxu3 %v2153_v42  ;;  %v2240_v42 = vld [vmem:[#allocation5 + $0x430] sm:$0xf] }
  0x8e   :  { %1389 = vmatpush.bf16.msrb.mxu1 %v2013_v53  ;;  %v1797_v53 = vor.u32 %v2460_v45, %v1794_v25  ;;  %v2454_v45 = vld [vmem:[#allocation5 + $0x84] sm:$0xf] }
  0x8f   :  { %v2474_v25 = vld [vmem:[#allocation5 + $0x124] sm:$0xf] }
  0x90   :  { %v2641_v57 = vpop.permute.xlu1 %2640  ;;  %v2631_v59 = vpop.permute.xlu0 %2630 }
  0x91   :  { %v2643_v31 = vunpack.i.h.bf16 %v2641_v57  ;;  %v2642_v58 = vunpack.i.l.bf16 %v2641_v57  ;;  %v2633_v63 = vunpack.i.h.bf16 %v2631_v59  ;;  %v2632_v2 = vunpack.i.l.bf16 %v2631_v59  ;;  %v2577_v57 = vld [vmem:[#allocation5 + $0x454] sm:$0xf0]  ;;  %v2464_v59 = vld [vmem:[#allocation5 + $0xd4] sm:$0xf] }
  0x92   :  { %v2257_v1 = vor.u32 %v2577_v57, %v2256_v56  ;;  %1390 = vmatpush.bf16.msrb.mxu1 %v2005_v15  ;;  %v2508_v56 = vld [vmem:[#allocation5 + $0x234] sm:$0xf]  ;;  %v1986_v57 = vld [vmem:[#allocation5 + $0x238] sm:$0xf0]  ;;  %v2671_v15 = vpop.permute.xlu2 %2670 }
  0x93   :  { %v3045_v11 = vpack.c.bf16 %v2643_v31, %v2642_v58  ;;  %v3047_v12 = vpack.c.bf16 %v2633_v63, %v2632_v2  ;;  %v2484_v31 = vld [vmem:[#allocation5 + $0x174] sm:$0xf]  ;;  %v1890_v58 = vld [vmem:[#allocation5 + $0x178] sm:$0xf0]  ;;  %v1813_v63 = vor.u32 %v2464_v59, %v1810_v0  ;;  %v2232_v59 = vld [vmem:[#allocation5 + $0x420] sm:$0xf]  ;;  %v1989_v60 = vor.u32 %v2508_v56, %v1986_v57 }
  0x94   :  { %v1893_v2 = vor.u32 %v2484_v31, %v1890_v58  ;;  %v2478_v58 = vld [vmem:[#allocation5 + $0x144] sm:$0xf]  ;;  %v1962_v56 = vld [vmem:[#allocation5 + $0x208] sm:$0xf0] }
  0x95   :  { %2280 = vmatmul.msk.bf16.vlgmr.msra.gmra.mxu0 %vm3041_vm12, %v3047_v12  ;;  %2292 = vmatmul.msk.bf16.vlgmr.msra.gmra.mxu2 %vm3028_vm10, %v3045_v11 }
  0x96   :  { %1293 = vmatpush.bf16.msra.mxu0 %v2273_v24  ;;  %1331 = vmatpush.bf16.msra.mxu2 %v1829_v32  ;;  %v1802_v24 = vld [vmem:[#allocation5 + $0xc8] sm:$0xf0] }
  0x97   :  { %v1805_v27 = vor.u32 %v2462_v20, %v1802_v24  ;;  %v1882_v32 = vld [vmem:[#allocation5 + $0x168] sm:$0xf0]  ;;  %v2224_v20 = vld [vmem:[#allocation5 + $0x410] sm:$0xf]  ;;  %v2569_v24 = vld [vmem:[#allocation5 + $0x414] sm:$0xf0] }
  0x98   :  { %v2646_v39 = vpop.permute.xlu1 %2645  ;;  %v2636_v40 = vpop.permute.xlu0 %2635 }
  0x99   :  { %v2648_v50 = vunpack.i.h.bf16 %v2646_v39  ;;  %v2647_v51 = vunpack.i.l.bf16 %v2646_v39  ;;  %v2638_v61 = vunpack.i.h.bf16 %v2636_v40  ;;  %v2637_v62 = vunpack.i.l.bf16 %v2636_v40 }
  0x9a   :  { %1294 = vmatpush.bf16.msra.mxu0 %v2265_v41  ;;  %1332 = vmatpush.bf16.msra.mxu2 %v1821_v52  ;;  %v1885_v39 = vor.u32 %v2482_v14, %v1882_v32  ;;  %v1997_v41 = vor.u32 %v2510_v35, %v1994_v37  ;;  %v1874_v52 = vld [vmem:[#allocation5 + $0x158] sm:$0xf0]  ;;  %v2225_v14 = vor.u32 %v2569_v24, %v2224_v20  ;;  %v2476_v35 = vld [vmem:[#allocation5 + $0x134] sm:$0xf]  ;;  %v1946_v20 = vld [vmem:[#allocation5 + $0x1e8] sm:$0xf0] }
  0x9b   :  { %v3055_v54 = vpack.c.bf16 %v2648_v50, %v2647_v51  ;;  %v3062_v22 = vpack.c.bf16 %v2638_v61, %v2637_v62  ;;  %v2241_v51 = vor.u32 %v2573_v43, %v2240_v42  ;;  %v1877_v55 = vor.u32 %v2480_v34, %v1874_v52  ;;  %v2571_v61 = vld [vmem:[#allocation5 + $0x424] sm:$0xf0]  ;;  %v2458_v62 = vld [vmem:[#allocation5 + $0xa4] sm:$0xf]  ;;  %v1778_v32 = vld [vmem:[#allocation5 + $0x98] sm:$0xf0] }
  0x9c   :  { %1391 = vmatpush.bf16.msrb.mxu1 %v1997_v41  ;;  %v2233_v0 = vor.u32 %v2571_v61, %v2232_v59  ;;  %v2216_v41 = vld [vmem:[#allocation5 + $0x400] sm:$0xf]  ;;  %v2567_v43 = vld [vmem:[#allocation5 + $0x404] sm:$0xf0]  ;;  %v1850_v34 = vld [vmem:[#allocation5 + $0x128] sm:$0xf0] }
  0x9d   :  { %2298 = vmatmul.msk.bf16.vlgmr.msra.gmra.mxu3 %vm3041_vm12, %v3055_v54  ;;  %v2502_v52 = vld [vmem:[#allocation5 + $0x204] sm:$0xf]  ;;  %v2500_v59 = vld [vmem:[#allocation5 + $0x1f4] sm:$0xf] }
  0x9e   :  { %1295 = vmatpush.bf16.msra.mxu0 %v2257_v1  ;;  %1333 = vmatpush.bf16.msra.mxu2 %v1813_v63  ;;  %v1786_v1 = vld [vmem:[#allocation5 + $0xa8] sm:$0xf0]  ;;  %v1965_v57 = vor.u32 %v2502_v52, %v1962_v56  ;;  %v2472_v61 = vld [vmem:[#allocation5 + $0x114] sm:$0xf]  ;;  %v2470_v24 = vld [vmem:[#allocation5 + $0x104] sm:$0xf] }
  0x9f   :  { %1350 = vmatpush.bf16.msra.mxu3 %v1893_v2  ;;  %v1789_v31 = vor.u32 %v2458_v62, %v1786_v1  ;;  %v1866_v63 = vld [vmem:[#allocation5 + $0x148] sm:$0xf0]  ;;  %v2506_v2 = vld [vmem:[#allocation5 + $0x224] sm:$0xf]  ;;  %v3082_v62 = vld [vmem:[#allocation2] sm:$0xff]  }
  0xa0   :  { %v2666_v23 = vpop.permute.xlu1 %2665  ;;  %v2661_v38 = vpop.permute.xlu0 %2660  ;;  %v1869_v5 = vor.u32 %v2478_v58, %v1866_v63  ;;  %1392 = vmatpush.bf16.msrb.mxu1 %v1989_v60  ;;  %v1981_v18 = vor.u32 %v2506_v2, %v1978_v10  ;;  %v1954_v60 = vld [vmem:[#allocation5 + $0x1f8] sm:$0xf0]  ;;  %v2576_v52 = vld [vmem:[#allocation5 + $0x454] sm:$0xf]  ;;  %v2494_v56 = vld [vmem:[#allocation5 + $0x1c4] sm:$0xf] }
  0xa1   :  { %v2668_v21 = vunpack.i.h.bf16 %v2666_v23  ;;  %v2667_v17 = vunpack.i.l.bf16 %v2666_v23  ;;  %v2663_v46 = vunpack.i.h.bf16 %v2661_v38  ;;  %v2662_v50 = vunpack.i.l.bf16 %v2661_v38  ;;  %v2456_v23 = vld [vmem:[#allocation5 + $0x94] sm:$0xf]  ;;  %v2082_v58 = vld [vmem:[#allocation5 + $0x2f8] sm:$0xf0] }
  0xa2   :  { %1296 = vmatpush.bf16.msra.mxu0 %v2249_v26  ;;  %1334 = vmatpush.bf16.msra.mxu2 %v1805_v27  ;;  %v2673_v26 = vunpack.i.h.bf16 %v2671_v15  ;;  %v2672_v27 = vunpack.i.l.bf16 %v2671_v15  ;;  %v2504_v38 = vld [vmem:[#allocation5 + $0x214] sm:$0xf]  ;;  %v1957_v1 = vor.u32 %v2500_v59, %v1954_v60  ;;  %v2274_v10 = vld [vmem:[#allocation5 + $0x478] sm:$0xf0]  ;;  %v2498_v15 = vld [vmem:[#allocation5 + $0x1e4] sm:$0xf] }
  0xa3   :  { %v3064_v40 = vpack.c.bf16 %v2668_v21, %v2667_v17  ;;  %1351 = vmatpush.bf16.msra.mxu3 %v1885_v39  ;;  %v3075_v3 = vpack.c.bf16 %v2663_v46, %v2662_v50  ;;  %v1858_v21 = vld [vmem:[#allocation5 + $0x138] sm:$0xf0]  ;;  %v1781_v17 = vor.u32 %v2456_v23, %v1778_v32  ;;  %v1770_v46 = vld [vmem:[#allocation5 + $0x88] sm:$0xf0]  ;;  %v2217_v50 = vor.u32 %v2567_v43, %v2216_v41  ;;  %v2526_v60 = vld [vmem:[#allocation5 + $0x2c4] sm:$0xf] }
  0xa4   :  { %v1861_v37 = vor.u32 %v2476_v35, %v1858_v21  ;;  %v1970_v39 = vld [vmem:[#allocation5 + $0x218] sm:$0xf0]  ;;  %1393 = vmatpush.bf16.msrb.mxu1 %v1981_v18  ;;  %v1834_v23 = vld [vmem:[#allocation5 + $0x108] sm:$0xf0]  ;;  %v2578_v35 = vld [vmem:[#allocation5 + $0x464] sm:$0xf] }
  0xa5   :  { %2283 = vmatmul.msk.bf16.gmra.mxu0 %vm3041_vm12, %v3062_v22  ;;  %2295 = vmatmul.msk.bf16.gmra.mxu2 %vm3028_vm10, %v3060_v36  ;;  %v1973_v42 = vor.u32 %v2504_v38, %v1970_v39  ;;  %v2074_v32 = vld [vmem:[#allocation5 + $0x2e8] sm:$0xf0]  ;;  %v2496_v39 = vld [vmem:[#allocation5 + $0x1d4] sm:$0xf]  ;;  %v1938_v41 = vld [vmem:[#allocation5 + $0x1d8] sm:$0xf0] }
  0xa6   :  { %2307 = vmatmul.msk.bf16.gmra.mxu1 %vm3028_vm10, %v3064_v40  ;;  %1297 = vmatpush.bf16.msra.mxu0 %v2241_v51  ;;  %v1773_v51 = vor.u32 %v2454_v45, %v1770_v46  ;;  %v2266_v21 = vld [vmem:[#allocation5 + $0x468] sm:$0xf0]  ;;  %v1941_v48 = vor.u32 %v2496_v39, %v1938_v41  ;;  %v2066_v46 = vld [vmem:[#allocation5 + $0x2d8] sm:$0xf0] }
  0xa7   :  { %1335 = vmatpush.bf16.msra.mxu2 %v1797_v53  ;;  %1352 = vmatpush.bf16.msra.mxu3 %v1877_v55  ;;  %v3080_v53 = vpack.c.bf16 %v2673_v26, %v2672_v27  ;;  %v1853_v55 = vor.u32 %v2474_v25, %v1850_v34  ;;  %v1949_v26 = vor.u32 %v2498_v15, %v1946_v20  ;;  %v1930_v59 = vld [vmem:[#allocation5 + $0x1c8] sm:$0xf0]  ;;  %v1922_v20 = vld [vmem:[#allocation5 + $0x1b8] sm:$0xf0] }
  0xa8   :  { %1394 = vmatpush.bf16.msrb.mxu1 %v1973_v42  ;;  %v1837_v27 = vor.u32 %v2470_v24, %v1834_v23  ;;  %v2269_v38 = vor.u32 %v2578_v35, %v2266_v21  ;;  %v2528_v42 = vld [vmem:[#allocation5 + $0x2d4] sm:$0xf]  ;;  %v3103_v23 = vld [vmem:[#allocation2 + $0x8] sm:$0xff]   ;;  %v1914_v41 = vld [vmem:[#allocation5 + $0x1a8] sm:$0xf0] }
  0xa9   :  { %v2069_v25 = vor.u32 %v2528_v42, %v2066_v46  ;;  %v2524_v24 = vld [vmem:[#allocation5 + $0x2b4] sm:$0xf]  ;;  %v2522_v42 = vld [vmem:[#allocation5 + $0x2a4] sm:$0xf] }
  0xaa   :  { %1298 = vmatpush.bf16.msra.mxu0 %v2233_v0  ;;  %v1842_v0 = vld [vmem:[#allocation5 + $0x118] sm:$0xf0]  ;;  %v2572_v21 = vld [vmem:[#allocation5 + $0x434] sm:$0xf]  ;;  %v2542_v46 = vld [vmem:[#allocation5 + $0x344] sm:$0xf] }
  0xab   :  { %1336 = vmatpush.bf16.msra.mxu2 %v1789_v31  ;;  %1353 = vmatpush.bf16.msra.mxu3 %v1869_v5  ;;  %v2532_v31 = vld [vmem:[#allocation5 + $0x2f4] sm:$0xf]  ;;  %v1845_v63 = vor.u32 %v2472_v61, %v1842_v0  ;;  %v2058_v61 = vld [vmem:[#allocation5 + $0x2c8] sm:$0xf0] }
  0xac   :  { %v2085_v2 = vor.u32 %v2532_v31, %v2082_v58  ;;  %v2580_v5 = vld [vmem:[#allocation5 + $0x474] sm:$0xf]  ;;  %1395 = vmatpush.bf16.msrb.mxu1 %v1965_v57  ;;  %v2061_v0 = vor.u32 %v2526_v60, %v2058_v61  ;;  %v2546_v31 = vld [vmem:[#allocation5 + $0x364] sm:$0xf]  ;;  %v2138_v58 = vld [vmem:[#allocation5 + $0x368] sm:$0xf0] }
  0xad   :  { %2301 = vmatmul.msk.bf16.gmra.mxu3 %vm3041_vm12, %v3075_v3  ;;  %v2277_v18 = vor.u32 %v2580_v5, %v2274_v10  ;;  %v2141_v5 = vor.u32 %v2546_v31, %v2138_v58  ;;  %v2250_v10 = vld [vmem:[#allocation5 + $0x448] sm:$0xf0]  ;;  %v2520_v60 = vld [vmem:[#allocation5 + $0x294] sm:$0xf]  ;;  %v2034_v61 = vld [vmem:[#allocation5 + $0x298] sm:$0xf0] }
  0xae   :  { %1299 = vmatpush.bf16.msra.mxu0 %v2225_v14  ;;  %v2530_v14 = vld [vmem:[#allocation5 + $0x2e4] sm:$0xf]  ;;  %v2037_v31 = vor.u32 %v2520_v60, %v2034_v61  ;;  %v2556_v61 = vld [vmem:[#allocation5 + $0x3b4] sm:$0xf] }
  0xaf   :  { %1337 = vmatpush.bf16.msra.mxu2 %v1781_v17  ;;  %1354 = vmatpush.bf16.msra.mxu3 %v1861_v37  ;;  %v2681_v37 = vpop.permute.xlu1 %2680  ;;  %v2558_v60 = vld [vmem:[#allocation5 + $0x3c4] sm:$0xf] }
  0xb0   :  { %v2683_v43 = vunpack.i.h.bf16 %v2681_v37  ;;  %v2682_v45 = vunpack.i.l.bf16 %v2681_v37  ;;  %v2242_v37 = vld [vmem:[#allocation5 + $0x438] sm:$0xf0]  ;;  %v2586_v17 = vld [vmem:[#allocation8 + $0x20] sm:$0xff] }
  0xb1   :  { %v2245_v39 = vor.u32 %v2572_v21, %v2242_v37  ;;  %v2218_v37 = vld [vmem:[#allocation5 + $0x408] sm:$0xf0] }
  0xb2   :  { %1300 = vmatpush.bf16.msra.mxu0 %v2217_v50  ;;  %v2548_v50 = vld [vmem:[#allocation5 + $0x374] sm:$0xf] }
  0xb3   :  { %1338 = vmatpush.bf16.msra.mxu2 %v1773_v51  ;;  %1355 = vmatpush.bf16.msra.mxu3 %v1853_v55  ;;  %v2146_v51 = vld [vmem:[#allocation5 + $0x378] sm:$0xf0] }
  0xb4   :  { %v2149_v34 = vor.u32 %v2548_v50, %v2146_v51  ;;  %v2258_v55 = vld [vmem:[#allocation5 + $0x458] sm:$0xf0]  ;;  %v2122_v50 = vld [vmem:[#allocation5 + $0x348] sm:$0xf0]  ;;  %v2570_v51 = vld [vmem:[#allocation5 + $0x424] sm:$0xf] }
  0xb5   :  { %1225 = vmatmul.bf16.vlgmr.msrb.gmra.mxu0 %v3082_v62  ;;  %2310 = vmatmul.msk.bf16.vlgmr.msrb.gmra.mxu2 %vm3041_vm12, %v3080_v53  ;;  %v2261_v57 = vor.u32 %v2576_v52, %v2258_v55  ;;  %v2676_v55 = vpop.permute.xlu0 %2675 }
  0xb6   :  { %2328 = vmatmul.msk.bf16.vlgmr.msra.gmra.mxu1 %vm3041_vm12, %v3047_v12  ;;  %1369 = vmatpush.bf16.msrb.mxu0 %v1957_v1  ;;  %v2077_v12 = vor.u32 %v2530_v14, %v2074_v32  ;;  %v1933_v1 = vor.u32 %v2494_v56, %v1930_v59  ;;  %v2544_v14 = vld [vmem:[#allocation5 + $0x354] sm:$0xf]  ;;  %v2130_v32 = vld [vmem:[#allocation5 + $0x358] sm:$0xf0] }
  0xb7   :  { %1356 = vmatpush.bf16.msra.mxu3 %v1845_v63  ;;  %1407 = vmatpush.bf16.msrb.mxu2 %v2085_v2  ;;  %v2574_v63 = vld [vmem:[#allocation5 + $0x444] sm:$0xf]  ;;  %v3101_v2 = vpack.c.bf16 %v2683_v43, %v2682_v45  ;;  %v2042_v43 = vld [vmem:[#allocation5 + $0x2a8] sm:$0xf0]  ;;  %v1906_v59 = vld [vmem:[#allocation5 + $0x198] sm:$0xf0] }
  0xb8   :  { %1464 = vmatpush.bf16.msra.mxu1 %v2277_v18  ;;  %v2253_v15 = vor.u32 %v2574_v63, %v2250_v10  ;;  %v2492_v18 = vld [vmem:[#allocation5 + $0x1b4] sm:$0xf]  ;;  %v2486_v10 = vld [vmem:[#allocation5 + $0x184] sm:$0xf] }
  0xb9   :  { %v2568_v63 = vld [vmem:[#allocation5 + $0x414] sm:$0xf] }
  0xba   :  { %1370 = vmatpush.bf16.msrb.mxu0 %v1949_v26  ;;  %v1925_v26 = vor.u32 %v2492_v18, %v1922_v20  ;;  %v1898_v18 = vld [vmem:[#allocation5 + $0x188] sm:$0xf0]  ;;  %v2518_v20 = vld [vmem:[#allocation5 + $0x284] sm:$0xf] }
  0xbb   :  { %1357 = vmatpush.bf16.msra.mxu3 %v1837_v27  ;;  %1408 = vmatpush.bf16.msrb.mxu2 %v2077_v12  ;;  %v2050_v27 = vld [vmem:[#allocation5 + $0x2b8] sm:$0xf0]  ;;  %v2133_v12 = vor.u32 %v2544_v14, %v2130_v32  ;;  %v2538_v14 = vld [vmem:[#allocation5 + $0x324] sm:$0xf]  ;;  %v2106_v32 = vld [vmem:[#allocation5 + $0x328] sm:$0xf0] }
  0xbc   :  { %1465 = vmatpush.bf16.msra.mxu1 %v2269_v38  ;;  %v2053_v35 = vor.u32 %v2524_v24, %v2050_v27  ;;  %v2490_v38 = vld [vmem:[#allocation5 + $0x1a4] sm:$0xf]  ;;  %v2026_v24 = vld [vmem:[#allocation5 + $0x288] sm:$0xf0]  ;;  %v2109_v21 = vor.u32 %v2538_v14, %v2106_v32  ;;  %v2588_v14 = vld [vmem:[#allocation8 + $0x30] sm:$0xff] }
  0xbd   :  { %2316 = vmatmul.msk.bf16.vlgmr.msrb.gmra.mxu3 %vm3094_vm13, %v2953_v49  ;;  %v1917_v45 = vor.u32 %v2490_v38, %v1914_v41  ;;  %v2029_v27 = vor.u32 %v2518_v20, %v2026_v24  ;;  %v2210_v41 = vld [vmem:[#allocation5 + $0x3f8] sm:$0xf0]  ;;  %v2587_v32 = vld [vmem:[#allocation8 + $0x28] sm:$0xff] }
  0xbe   :  { %1371 = vmatpush.bf16.msrb.mxu0 %v1941_v48  ;;  %v2045_v48 = vor.u32 %v2522_v42, %v2042_v43  ;;  %v2536_v42 = vld [vmem:[#allocation5 + $0x314] sm:$0xf] }
  0xbf   :  { %1409 = vmatpush.bf16.msrb.mxu2 %v2069_v25  ;;  %1426 = vmatpush.bf16.msrb.mxu3 %v2149_v34  ;;  %v2125_v25 = vor.u32 %v2542_v46, %v2122_v50  ;;  %v2234_v34 = vld [vmem:[#allocation5 + $0x428] sm:$0xf0]  ;;  %v2562_v46 = vld [vmem:[#allocation5 + $0x3e4] sm:$0xf] }
  0xc0   :  { %1466 = vmatpush.bf16.msra.mxu1 %v2261_v57  ;;  %v2237_v56 = vor.u32 %v2570_v51, %v2234_v34  ;;  %v2488_v57 = vld [vmem:[#allocation5 + $0x194] sm:$0xf]  ;;  %v2202_v50 = vld [vmem:[#allocation5 + $0x3e8] sm:$0xf0]  ;;  %v2534_v51 = vld [vmem:[#allocation5 + $0x304] sm:$0xf] }
  0xc1   :  { %v1909_v16 = vor.u32 %v2488_v57, %v1906_v59  ;;  %v2090_v34 = vld [vmem:[#allocation5 + $0x308] sm:$0xf0]  ;;  %v2560_v57 = vld [vmem:[#allocation5 + $0x3d4] sm:$0xf] }
  0xc2   :  { %1372 = vmatpush.bf16.msrb.mxu0 %v1933_v1  ;;  %v2540_v1 = vld [vmem:[#allocation5 + $0x334] sm:$0xf]  ;;  %v2197_v59 = vor.u32 %v2560_v57, %v2194_v29 }
  0xc3   :  { %1410 = vmatpush.bf16.msrb.mxu2 %v2061_v0  ;;  %1427 = vmatpush.bf16.msrb.mxu3 %v2141_v5  ;;  %v2114_v0 = vld [vmem:[#allocation5 + $0x338] sm:$0xf0] }
  0xc4   :  { %1467 = vmatpush.bf16.msra.mxu1 %v2253_v15  ;;  %v2117_v58 = vor.u32 %v2540_v1, %v2114_v0  ;;  %v2226_v5 = vld [vmem:[#allocation5 + $0x418] sm:$0xf0] }
  0xc5   :  { %1230 = vmatmul.bf16.gmra.mxu0 %v3103_v23  ;;  %2313 = vmatmul.msk.bf16.gmra.mxu2 %vm3041_vm12, %v3101_v2  ;;  %v2229_v15 = vor.u32 %v2568_v63, %v2226_v5  ;;  %v2178_v1 = vld [vmem:[#allocation5 + $0x3b8] sm:$0xf0]  ;;  %v2552_v63 = vld [vmem:[#allocation5 + $0x394] sm:$0xf] }
  0xc6   :  { %2331 = vmatmul.msk.bf16.gmra.mxu1 %vm3041_vm12, %v3062_v22  ;;  %1373 = vmatpush.bf16.msrb.mxu0 %v1925_v26  ;;  %v3114_v22 = vpack.c.bf16 %v2973_v33, %v2986_v47  ;;  %v2678_v33 = vunpack.i.h.bf16 %v2676_v55  ;;  %v2677_v47 = vunpack.i.l.bf16 %v2676_v55  ;;  %v1901_v26 = vor.u32 %v2486_v10, %v1898_v18  ;;  %v2162_v5 = vld [vmem:[#allocation5 + $0x398] sm:$0xf0]  ;;  %v3147_v10 = vpop.f32.mrf.mxu1  ;;  %v2550_v18 = vld [vmem:[#allocation5 + $0x384] sm:$0xf] }
  0xc7   :  { %1411 = vmatpush.bf16.msrb.mxu2 %v2053_v35  ;;  %1428 = vmatpush.bf16.msrb.mxu3 %v2133_v12  ;;  %v2566_v35 = vld [vmem:[#allocation5 + $0x404] sm:$0xf]  ;;  %v2093_v55 = vor.u32 %v2534_v51, %v2090_v34  ;;  %v2181_v0 = vor.u32 %v2556_v61, %v2178_v1 }
  0xc8   :  { %1468 = vmatpush.bf16.msra.mxu1 %v2245_v39  ;;  %v3126_v12 = vpack.c.bf16 %v2678_v33, %v2677_v47  ;;  %v2221_v38 = vor.u32 %v2566_v35, %v2218_v37  ;;  %v2564_v39 = vld [vmem:[#allocation5 + $0x3f4] sm:$0xf]  ;;  %v2186_v33 = vld [vmem:[#allocation5 + $0x3c8] sm:$0xf0]  ;;  %v2585_v37 = vld [vmem:[#allocation8 + $0x18] sm:$0xff] }
  0xc9   :  { %v2213_v43 = vor.u32 %v2564_v39, %v2210_v41  ;;  %v2189_v47 = vor.u32 %v2558_v60, %v2186_v33  ;;  %v2584_v41 = vld [vmem:[#allocation8 + $0x10] sm:$0xff] }
  0xca   :  { %1374 = vmatpush.bf16.msrb.mxu0 %v1917_v45  ;;  %v2098_v45 = vld [vmem:[#allocation5 + $0x318] sm:$0xf0] }
  0xcb   :  { %1412 = vmatpush.bf16.msrb.mxu2 %v2045_v48  ;;  %1429 = vmatpush.bf16.msrb.mxu3 %v2125_v25  ;;  %v2101_v48 = vor.u32 %v2536_v42, %v2098_v45  ;;  %v2205_v25 = vor.u32 %v2562_v46, %v2202_v50  ;;  %v2583_v42 = vld [vmem:[#allocation8 + $0x8] sm:$0xff]  ;;  %v2582_v45 = vld [vmem:[#allocation8] sm:$0xff] }
  0xcc   :  { %1469 = vmatpush.bf16.msra.mxu1 %v2237_v56  ;;  %v2686_v56 = vpop.permute.xlu2 %2685 }
  0xcd   :  { %2319 = vmatmul.msk.bf16.gmra.mxu3 %vm3119_vm14, %v3114_v22 }
  0xce   :  { %1375 = vmatpush.bf16.msrb.mxu0 %v1909_v16 }
  0xcf   :  { %1413 = vmatpush.bf16.msrb.mxu2 %v2037_v31  ;;  %1430 = vmatpush.bf16.msrb.mxu3 %v2117_v58  ;;  %v2170_v31 = vld [vmem:[#allocation5 + $0x3a8] sm:$0xf0] }
  0xd0   :  { %1470 = vmatpush.bf16.msra.mxu1 %v2229_v15  ;;  %v2165_v15 = vor.u32 %v2552_v63, %v2162_v5 }
  0xd2   :  { %1376 = vmatpush.bf16.msrb.mxu0 %v1901_v26 }
  0xd3   :  { %1414 = vmatpush.bf16.msrb.mxu2 %v2029_v27  ;;  %1431 = vmatpush.bf16.msrb.mxu3 %v2109_v21  ;;  %v2589_v27 = vld [vmem:[#allocation8 + $0x38] sm:$0xff] }
  0xd4   :  { %1471 = vmatpush.bf16.msra.mxu1 %v2221_v38 }
  0xd5   :  { %2322 = vmatmul.msk.bf16.vlgmr.msra.gmra.mxu0 %vm3028_vm10, %v3126_v12  ;;  %2334 = vmatmul.msk.bf16.vlgmr.msra.gmra.mxu2 %vm3000_vm7, %v2995_v19  ;;  %v2688_v19 = vunpack.i.h.bf16 %v2686_v56 }
  0xd6   :  { %1396 = vmatmul.bf16.vlgmr.msrb.gmra.mxu1 %v3082_v62  ;;  %1445 = vmatpush.bf16.msra.mxu0 %v2213_v43  ;;  %v2687_v62 = vunpack.i.l.bf16 %v2686_v56 }
  0xd7   :  { %1432 = vmatpush.bf16.msrb.mxu3 %v2101_v48  ;;  %1627 = vmatpush.bf16.msra.mxu2 %v2589_v27  ;;  %v3186_v48 = vld [vmem:[#allocation7] sm:$0x3] }
  0xd8   :  { %v2324_v16 = vpack.c.bf16 %v2688_v19, %v2687_v62 }
  0xda   :  { %1446 = vmatpush.bf16.msra.mxu0 %v2205_v25  ;;  %v417_v25 = vperm.slane %v3186_v48, 0 }
  0xdb   :  { %1433 = vmatpush.bf16.msrb.mxu3 %v2093_v55  ;;  %1628 = vmatpush.bf16.msra.mxu2 %v2588_v14 }
  0xdd   :  { %2340 = vmatmul.msk.bf16.vlgmr.msra.gmra.mxu3 %vm3028_vm10, %v3045_v11  ;;  %v2554_v11 = vld [vmem:[#allocation5 + $0x3a4] sm:$0xf] }
  0xde   :  { %1447 = vmatpush.bf16.msra.mxu0 %v2197_v59  ;;  %v2173_v58 = vor.u32 %v2554_v11, %v2170_v31 }
  0xdf   :  { %1629 = vmatpush.bf16.msra.mxu2 %v2587_v32 }
  0xe2   :  { %1448 = vmatpush.bf16.msra.mxu0 %v2189_v47 }
  0xe3   :  { %1630 = vmatpush.bf16.msra.mxu2 %v2586_v17 }
  0xe5   :  { %2325 = vmatmul.msk.bf16.gmra.mxu0 %vm3028_vm10, %v2324_v16  ;;  %2337 = vmatmul.msk.bf16.gmra.mxu2 %vm3014_vm8, %v3009_v30  ;;  %v2157_v30 = vor.u32 %v2550_v18, %v2154_v44 }
  0xe6   :  { %1401 = vmatmul.bf16.gmra.mxu1 %v3103_v23  ;;  %1449 = vmatpush.bf16.msra.mxu0 %v2181_v0 }
  0xe7   :  { %1631 = vmatpush.bf16.msra.mxu2 %v2585_v37 }
  0xea   :  { %1450 = vmatpush.bf16.msra.mxu0 %v2173_v58 }
  0xeb   :  { %1632 = vmatpush.bf16.msra.mxu2 %v2584_v41 }
  0xed   :  { %2343 = vmatmul.msk.bf16.gmra.mxu3 %vm3028_vm10, %v3060_v36  ;;  %v1171_v36 = vpop.f32.mrf.mxu1 }
  0xee   :  { %1451 = vmatpush.bf16.msra.mxu0 %v2165_v15 }
  0xef   :  { %1633 = vmatpush.bf16.msra.mxu2 %v2583_v42 }
  0xf2   :  { %1452 = vmatpush.bf16.msra.mxu0 %v2157_v30 }
  0xf3   :  { %1634 = vmatpush.bf16.msra.mxu2 %v2582_v45 }
  0xf5   :  { %2346 = vmatmul.msk.bf16.vlgmr.msrb.gmra.mxu0 %vm3041_vm12, %v3055_v54  ;;  %2352 = vmatmul.msk.bf16.vlgmr.msrb.gmra.mxu2 %vm3028_vm10, %v3032_v28  ;;  %v3161_v23 = vpop.f32.mrf.mxu1 }
  0xf6   :  { %2370 = vmatmul.msk.bf16.vlgmr.msra.gmra.mxu1 %vm3028_vm10, %v3126_v12 }
  0xfd   :  { %2358 = vmatmul.msk.bf16.vlgmr.msrb.gmra.mxu3 %vm3041_vm12, %v3080_v53  ;;  %v3171_v28 = vpop.f32.mrf.mxu1 }
 0x105   :  { %2349 = vmatmul.msk.bf16.gmra.mxu0 %vm3041_vm12, %v3075_v3  ;;  %2355 = vmatmul.msk.bf16.gmra.mxu2 %vm3028_vm10, %v3064_v40  ;;  %v1245_v53 = vpop.f32.mrf.mxu1 }
 0x106   :  { %2373 = vmatmul.msk.bf16.gmra.mxu1 %vm3028_vm10, %v2324_v16 }
 0x10d   :  { %2361 = vmatmul.msk.bf16.gmra.mxu3 %vm3041_vm12, %v3101_v2  ;;  %v1247_v24 = vpop.f32.mrf.mxu1 }
 0x112   :  { %v1150_v54 = vpop.f32.mrf.mxu0 }
 0x113   :  { %v1151_v55 = vadd.f32 %v1150_v54, %v417_v25 }
 0x115   :  { %2364 = vmatmul.msk.bf16.vlgmr.msra.gmra.mxu0 %vm3094_vm13, %v2953_v49  ;;  %v1170_v19 = vadd.f32 %v3147_v10, %v1151_v55 }
 0x118   :  { %v1188_v3 = vpop.f32.mrf.mxu2 }
 0x119   :  { %v1189_v60 = vadd.f32 %v1188_v3, %v1170_v19  ;;  %v2595_v19 = vld [vmem:[#allocation8 + $0x68] sm:$0xff] }
 0x11a   :  { %v1152_v20 = vpop.f32.mrf.mxu0 }
 0x11b   :  { %v1153_v56 = vadd.f32 %v1152_v20, %v417_v25 }
 0x11d   :  { %v1172_v33 = vadd.f32 %v1171_v36, %v1153_v56 }
 0x120   :  { %v1190_v26 = vpop.f32.mrf.mxu2  ;;  %v1207_v40 = vpop.f32.mrf.mxu3 }
 0x121   :  { %v1191_v47 = vadd.f32 %v1190_v26, %v1172_v33  ;;  %v1208_v16 = vadd.f32 %v1207_v40, %v1189_v60 }
 0x122   :  { %v1155_v13 = vpop.f32.mrf.mxu0 }
 0x123   :  { %v3182_v35 = vpop.f32.mrf.mxu1  ;;  %v1156_v15 = vadd.f32 %v1155_v13, %v417_v25 }
 0x125   :  { %2367 = vmatmul.msk.bf16.gmra.mxu0 %vm3119_vm14, %v3114_v22  ;;  %v1175_v36 = vadd.f32 %v3161_v23, %v1156_v15  ;;  %v2590_v15 = vld [vmem:[#allocation8 + $0x40] sm:$0xff] }
 0x128   :  { %v1193_v4 = vpop.f32.mrf.mxu2  ;;  %v1209_v2 = vpop.f32.mrf.mxu3 }
 0x129   :  { %v1210_v61 = vadd.f32 %v1209_v2, %v1191_v47  ;;  %v1194_v27 = vadd.f32 %v1193_v4, %v1175_v36  ;;  %v2597_v4 = vld [vmem:[#allocation8 + $0x78] sm:$0xff] }
 0x12a   :  { %v1157_v49 = vpop.f32.mrf.mxu0  ;;  %1646 = vmatpush.bf16.msra.mxu3 %v2597_v4 }
 0x12b   :  { %v3184_v39 = vpop.f32.mrf.mxu1  ;;  %v1158_v30 = vadd.f32 %v1157_v49, %v417_v25 }
 0x12d   :  { %v1177_v14 = vadd.f32 %v3171_v28, %v1158_v30 }
 0x130   :  { %v1195_v12 = vpop.f32.mrf.mxu2  ;;  %v1212_v21 = vpop.f32.mrf.mxu3 }
 0x131   :  { %v1213_v17 = vadd.f32 %v1212_v21, %v1194_v27 }
 0x132   :  { %v1226_v38 = vpop.f32.mrf.mxu0 }
 0x133   :  { %v3188_v46 = vpop.f32.mrf.mxu1  ;;  %v1227_v1 = vadd.f32 %v1226_v38, %v1208_v16  ;;  %v2593_v16 = vld [vmem:[#allocation8 + $0x58] sm:$0xff] }
 0x135   :  { %v1246_v63 = vadd.f32 %v1245_v53, %v1227_v1  ;;  %v1196_v53 = vadd.f32 %v1195_v12, %v1177_v14  ;;  %v2592_v1 = vld [vmem:[#allocation8 + $0x50] sm:$0xff] }
 0x138   :  { %v1214_v22 = vpop.f32.mrf.mxu3  ;;  %v1264_v52 = vpop.f32.mrf.mxu2 }
 0x139   :  { %v1265_v18 = vadd.f32 %v1264_v52, %v1246_v63  ;;  %v1215_v49 = vadd.f32 %v1214_v22, %v1196_v53 }
 0x13a   :  { %v1228_v43 = vpop.f32.mrf.mxu0 }
 0x13b   :  { %v3191_v57 = vpop.f32.mrf.mxu1  ;;  %v1229_v11 = vadd.f32 %v1228_v43, %v1210_v61 }
 0x13d   :  { %v1248_v44 = vadd.f32 %v1247_v24, %v1229_v11 }
 0x140   :  { %v1266_v50 = vpop.f32.mrf.mxu2  ;;  %v1283_v51 = vpop.f32.mrf.mxu3 }
 0x141   :  { %v1267_v10 = vadd.f32 %v1266_v50, %v1248_v44  ;;  %v1284_v54 = vadd.f32 %v1283_v51, %v1265_v18  ;;  %v2596_v50 = vld [vmem:[#allocation8 + $0x70] sm:$0xff]  ;;  %v418_v44 = vperm.slane %v3186_v48, 1 }
 0x142   :  { %v1231_v34 = vpop.f32.mrf.mxu0  ;;  %1647 = vmatpush.bf16.msra.mxu3 %v2596_v50 }
 0x143   :  { %v3194_v31 = vpop.f32.mrf.mxu1  ;;  %v1232_v38 = vadd.f32 %v1231_v34, %v1213_v17 }
 0x145   :  { %v1251_v43 = vadd.f32 %v3182_v35, %v1232_v38  ;;  %v2594_v35 = vld [vmem:[#allocation8 + $0x60] sm:$0xff] }
 0x146   :  { %1648 = vmatpush.bf16.msra.mxu3 %v2595_v19 }
 0x148   :  { %v1285_v29 = vpop.f32.mrf.mxu3  ;;  %v1269_v62 = vpop.f32.mrf.mxu2 }
 0x149   :  { %v1286_v3 = vadd.f32 %v1285_v29, %v1267_v10  ;;  %v1270_v45 = vadd.f32 %v1269_v62, %v1251_v43 }
 0x14a   :  { %v1233_v59 = vpop.f32.mrf.mxu0  ;;  %1649 = vmatpush.bf16.msra.mxu3 %v2594_v35 }
 0x14b   :  { %v3198_v32 = vpop.f32.mrf.mxu1  ;;  %v1234_v42 = vadd.f32 %v1233_v59, %v1215_v49 }
 0x14d   :  { %v1253_v28 = vadd.f32 %v3184_v39, %v1234_v42 }
 0x14e   :  { %1650 = vmatpush.bf16.msra.mxu3 %v2593_v16 }
 0x150   :  { %v1288_v0 = vpop.f32.mrf.mxu3  ;;  %v1271_v5 = vpop.f32.mrf.mxu2 }
 0x151   :  { %v1272_v21 = vadd.f32 %v1271_v5, %v1253_v28  ;;  %v1289_v51 = vadd.f32 %v1288_v0, %v1270_v45  ;;  %v1329_v28 = vadd.f32 %v3198_v32, %v418_v44 }
 0x152   :  { %v1302_v58 = vpop.f32.mrf.mxu0  ;;  %1651 = vmatpush.bf16.msra.mxu3 %v2592_v1 }
 0x153   :  { %v1303_v26 = vadd.f32 %v1302_v58, %v1284_v54  ;;  %v1397_v12 = vpop.f32.mrf.mxu1  ;;  %v2591_v58 = vld [vmem:[#allocation8 + $0x48] sm:$0xff]  ;;  %v1322_v54 = vadd.f32 %v3188_v46, %v418_v44  ;;  %v1327_v46 = vadd.f32 %v3194_v31, %v418_v44 }
 0x155   :  { %v1483_v13 = vmax.f32 %v1303_v26, 0.0  ;;  %v1324_v26 = vadd.f32 %v3191_v57, %v418_v44 }
 0x156   :  { %1652 = vmatpush.bf16.msra.mxu3 %v2591_v58 }
 0x158   :  { %v1290_v20 = vpop.f32.mrf.mxu3  ;;  %v1340_v24 = vpop.f32.mrf.mxu2 }
 0x159   :  { %v1291_v55 = vadd.f32 %v1290_v20, %v1272_v21  ;;  %v1341_v36 = vadd.f32 %v1340_v24, %v1322_v54  ;;  %v2689_v54 = vld [vmem:[%s3224_s4] ss:$0 sm:$0xff]  ;;  %s2830_s4 = smov [#allocation10]  }
 0x15a   :  { %v1304_v40 = vpop.f32.mrf.mxu0  ;;  %1653 = vmatpush.bf16.msra.mxu3 %v2590_v15  ;;  %s1685_s16 = sshll.u32 %s2830_s4, 4  ;;  %s1686_s16 = int_to_ptr.vmem [resolvable:$true] %s1685_s16 }
 0x15b   :  { %v1305_v2 = vadd.f32 %v1304_v40, %v1286_v3  ;;  %v1399_v33 = vpop.f32.mrf.mxu1 }
 0x15d   :  { %v1485_v37 = vmax.f32 %v1305_v2, 0.0 }
 0x15f   :  { %v1491_v41 = vpack.c.bf16 %v1485_v37, %v1483_v13 }
 0x160   :  { %v1359_v52 = vpop.f32.mrf.mxu3  ;;  %v1342_v25 = vpop.f32.mrf.mxu2 }
 0x161   :  { %1635 = vmatmul.bf16.vlgmr.msra.gmra.mxu2 %v1491_v41  ;;  %v1360_v40 = vadd.f32 %v1359_v52, %v1341_v36  ;;  %v1343_v27 = vadd.f32 %v1342_v25, %v1324_v26 }
 0x162   :  { %v1307_v23 = vpop.f32.mrf.mxu0 }
 0x163   :  { %v1308_v22 = vadd.f32 %v1307_v23, %v1289_v51  ;;  %v1402_v0 = vpop.f32.mrf.mxu1 }
 0x165   :  { %v1487_v59 = vmax.f32 %v1308_v22, 0.0 }
 0x168   :  { %v1361_v34 = vpop.f32.mrf.mxu3  ;;  %v1345_v39 = vpop.f32.mrf.mxu2 }
 0x169   :  { %v1362_v53 = vadd.f32 %v1361_v34, %v1343_v27  ;;  %v1346_v4 = vadd.f32 %v1345_v39, %v1327_v46 }
 0x16a   :  { %v1309_v56 = vpop.f32.mrf.mxu0 }
 0x16b   :  { %v1310_v29 = vadd.f32 %v1309_v56, %v1291_v55  ;;  %v1404_v30 = vpop.f32.mrf.mxu1 }
 0x16d   :  { %v1489_v60 = vmax.f32 %v1310_v29, 0.0 }
 0x16f   :  { %v1493_v62 = vpack.c.bf16 %v1489_v60, %v1487_v59 }
 0x170   :  { %v1364_v61 = vpop.f32.mrf.mxu3  ;;  %v1347_v63 = vpop.f32.mrf.mxu2 }
 0x171   :  { %1640 = vmatmul.bf16.gmra.mxu2 %v1493_v62  ;;  %v1365_v50 = vadd.f32 %v1364_v61, %v1346_v4  ;;  %v1348_v25 = vadd.f32 %v1347_v63, %v1329_v28 }
 0x172   :  { %v1378_v47 = vpop.f32.mrf.mxu0 }
 0x173   :  { %v1379_v14 = vadd.f32 %v1378_v47, %v1360_v40  ;;  %v1473_v2 = vpop.f32.mrf.mxu1 }
 0x175   :  { %v1398_v13 = vadd.f32 %v1397_v12, %v1379_v14 }
 0x178   :  { %v1366_v5 = vpop.f32.mrf.mxu3  ;;  %v1416_v10 = vpop.f32.mrf.mxu2 }
 0x179   :  { %v1417_v48 = vadd.f32 %v1416_v10, %v1398_v13  ;;  %v1367_v34 = vadd.f32 %v1366_v5, %v1348_v25 }
 0x17a   :  { %v1380_v11 = vpop.f32.mrf.mxu0 }
 0x17b   :  { %v1381_v37 = vadd.f32 %v1380_v11, %v1362_v53  ;;  %v1475_v43 = vpop.f32.mrf.mxu1 }
 0x17d   :  { %v1400_v41 = vadd.f32 %v1399_v33, %v1381_v37 }
 0x180   :  { %v1435_v20 = vpop.f32.mrf.mxu3  ;;  %v1418_v17 = vpop.f32.mrf.mxu2 }
 0x181   :  { %v1436_v42 = vadd.f32 %v1435_v20, %v1417_v48  ;;  %v1419_v23 = vadd.f32 %v1418_v17, %v1400_v41 }
 0x182   :  { %v1383_v18 = vpop.f32.mrf.mxu0 }
 0x183   :  { %v1384_v55 = vadd.f32 %v1383_v18, %v1365_v50  ;;  %v1478_v60 = vpop.f32.mrf.mxu1 }
 0x185   :  { %v1403_v31 = vadd.f32 %v1402_v0, %v1384_v55 }
 0x188   :  { %v1437_v49 = vpop.f32.mrf.mxu3  ;;  %v1421_v52 = vpop.f32.mrf.mxu2 }
 0x189   :  { %v1438_v57 = vadd.f32 %v1437_v49, %v1419_v23  ;;  %v1422_v62 = vadd.f32 %v1421_v52, %v1403_v31 }
 0x18a   :  { %v1385_v3 = vpop.f32.mrf.mxu0 }
 0x18b   :  { %v1386_v19 = vadd.f32 %v1385_v3, %v1367_v34  ;;  %v1480_v5 = vpop.f32.mrf.mxu1 }
 0x18d   :  { %v1405_v39 = vadd.f32 %v1404_v30, %v1386_v19 }
 0x190   :  { %v1440_v51 = vpop.f32.mrf.mxu3  ;;  %v1423_v33 = vpop.f32.mrf.mxu2 }
 0x191   :  { %v1441_v32 = vadd.f32 %v1440_v51, %v1422_v62  ;;  %v1424_v16 = vadd.f32 %v1423_v33, %v1405_v39 }
 0x192   :  { %v1454_v38 = vpop.f32.mrf.mxu0 }
 0x193   :  { %v1455_v24 = vadd.f32 %v1454_v38, %v1436_v42 }
 0x195   :  { %v1474_v21 = vadd.f32 %v1473_v2, %v1455_v24 }
 0x197   :  { %v1484_v56 = vmax.f32 %v1474_v21, 0.0 }
 0x198   :  { %v1442_v47 = vpop.f32.mrf.mxu3 }
 0x199   :  { %v1443_v1 = vadd.f32 %v1442_v47, %v1424_v16 }
 0x19a   :  { %v1456_v45 = vpop.f32.mrf.mxu0 }
 0x19b   :  { %v1457_v12 = vadd.f32 %v1456_v45, %v1438_v57 }
 0x19d   :  { %v1476_v22 = vadd.f32 %v1475_v43, %v1457_v12 }
 0x19f   :  { %v1486_v29 = vmax.f32 %v1476_v22, 0.0 }
 0x1a1   :  { %v1492_v59 = vpack.c.bf16 %v1486_v29, %v1484_v56 }
 0x1a2   :  { %v1459_v35 = vpop.f32.mrf.mxu0 }
 0x1a3   :  { %1654 = vmatmul.bf16.vlgmr.msra.gmra.mxu3 %v1492_v59  ;;  %v1460_v61 = vadd.f32 %v1459_v35, %v1441_v32 }
 0x1a5   :  { %v1479_v58 = vadd.f32 %v1478_v60, %v1460_v61 }
 0x1a7   :  { %v1488_v18 = vmax.f32 %v1479_v58, 0.0 }
 0x1aa   :  { %v1461_v11 = vpop.f32.mrf.mxu0 }
 0x1ab   :  { %v1462_v63 = vadd.f32 %v1461_v11, %v1443_v1 }
 0x1ad   :  { %v1481_v15 = vadd.f32 %v1480_v5, %v1462_v63 }
 0x1af   :  { %v1490_v0 = vmax.f32 %v1481_v15, 0.0 }
 0x1b1   :  { %v1494_v44 = vpack.c.bf16 %v1490_v0, %v1488_v18 }
 0x1b3   :  { %1659 = vmatmul.bf16.gmra.mxu3 %v1494_v44 }
 0x1e4   :  { %v1636_v10 = vpop.f32.mrf.mxu2 }
 0x1e5   :  { %v1637_v36 = vadd.f32 %v2689_v54, %v1636_v10 }
 0x1ec   :  { %v1638_v30 = vpop.f32.mrf.mxu2 }
 0x1ed   :  { %v1639_v26 = vadd.f32 %v2689_v54, %v1638_v30 }
 0x1f4   :  { %v1641_v2 = vpop.f32.mrf.mxu2 }
 0x1f5   :  { %v1642_v38 = vadd.f32 %v2689_v54, %v1641_v2 }
 0x1fc   :  { %v1643_v48 = vpop.f32.mrf.mxu2 }
 0x1fd   :  { %v1644_v42 = vadd.f32 %v2689_v54, %v1643_v48 }
 0x226   :  { %v1655_v20 = vpop.f32.mrf.mxu3 }
 0x227   :  { %v1656_v3 = vadd.f32 %v1655_v20, %v1637_v36 }
 0x229   :  { %v1665_v27 = vmax.f32 %v1656_v3, 0.0 }
 0x22b   :  { %v1669_v17 = vadd.f32 %v2885_v6, %v1665_v27 }
 0x22e   :  { %v1657_v40 = vpop.f32.mrf.mxu3 }
 0x22f   :  { %v1658_v14 = vadd.f32 %v1657_v40, %v1639_v26 }
 0x231   :  { %v1666_v53 = vmax.f32 %v1658_v14, 0.0 }
 0x233   :  { %v1670_v13 = vadd.f32 %v2887_v7, %v1666_v53 }
 0x235   :  { %v2609_v37 = vpack.c.bf16 %v1670_v13, %v1669_v17 }
 0x236   :  { %v1660_v49 = vpop.f32.mrf.mxu3 }
 0x237   :  { %2610 = vst [vmem:[#allocation10] sm:$0xff] %v2609_v37   ;;  %v1661_v41 = vadd.f32 %v1660_v49, %v1642_v38 }
 0x239   :  { %v1667_v23 = vmax.f32 %v1661_v41, 0.0 }
 0x23b   :  { %v1671_v6 = vadd.f32 %v2891_v9, %v1667_v23 }
 0x23e   :  { %v1662_v46 = vpop.f32.mrf.mxu3 }
 0x23f   :  { %v1663_v24 = vadd.f32 %v1662_v46, %v1644_v42 }
 0x241   :  { %v1668_v43 = vmax.f32 %v1663_v24, 0.0 }
 0x243   :  { %v1672_v7 = vadd.f32 %v2889_v8, %v1668_v43 }
 0x245   :  { %v2614_v4 = vpack.c.bf16 %v1672_v7, %v1671_v6 }
 0x247   :  { %2617 = vst [vmem:[#allocation10 + $0x8] sm:$0xff] %v2614_v4  }
 0x248   :  { %1693 = dma.vmem_to_hbm [thread:$0]  %s1686_s16, 256, %s1688_s19, [#allocation4], %s2824_s30, %s2824_s30, %s2825_s6  }
 0x249   :  { %2818 = dma.done.wait [#allocation4], 256  }
 0x24a   :  { %2819 = vsyncadd [#allocation4], 4294967040 }
 0x24b   :  { %1698 = vsyncpa [#allocation3], 1 }
 0x24c   :  { %1699 = vsyncpa [#allocation6], 1 }
 0x24d   :  { %1700 = vsyncpa [#allocation9], 1 }
 0x24e   :  { %1701 = vsyncpa [#allocation4], 1 }

</bundles_post_ra>
